<compile_context>
chip_gen: v6e
topology: v6e:2x2x1
jax: 0.10.0
libtpu: 0.0.40
codegen_flags: <defaults>
</compile_context>

<pallas_src>
import functools

import jax
import jax.numpy as jnp
from jax import lax
from jax.experimental import pallas as pl
from jax.experimental.pallas import tpu as pltpu

NUM_CLUSTERS = 3
NUM_ITERS = 10


def _kmeans_kernel(x_ref, cent_ref, label_ref, *, num_clusters, num_iters,
                   valid_n):
    # x_ref block: (Bt, C+1, Npad) bf16; last channel row = valid-token mask.
    Bt, Caug, N = x_ref.shape
    C = Caug - 1
    K = num_clusters

    # ---- loop-invariant iotas (hoisted; JAX does not CSE broadcast_in_dim
    # inside loop bodies).
    row = lax.broadcasted_iota(jnp.int32, (K, N), 0)          # cluster id k
    col = lax.broadcasted_iota(jnp.int32, (K, N), 1)          # token id n

    # Deterministic init: K evenly spaced (valid) tokens, gathered via one
    # matmul (selection one-hot contracted over N) -> no column gather.
    stride = max(valid_n // K, 1)
    sel = (col == row * stride).astype(jnp.bfloat16)          # (K, N)

    def init_state(xb):
        cent0 = lax.dot_general(sel, xb, (((1,), (1,)), ((), ())),
                                preferred_element_type=jnp.float32)  # (K, C+1)
        return (cent0,
                jnp.zeros((1, N), jnp.int32),                 # labels
                jnp.zeros((K, Caug), jnp.float32))            # sums | counts

    def step_sample(xb, cent):
        # ---- assignment: dist(k,n) = ||c_k||^2 - 2 c_k.x_n (constant-in-k
        # terms dropped / irrelevant for argmin).  MXU matmul in bf16, f32 acc.
        c_lo = cent.astype(jnp.bfloat16)
        cx = lax.dot_general(c_lo, xb, (((1,), (0,)), ((), ())),
                             preferred_element_type=jnp.float32)     # (K, N)
        c_f = c_lo.astype(jnp.float32)
        c2 = jnp.sum(c_f * c_f, axis=1, keepdims=True)                # (K, 1)
        dist = c2 - 2.0 * cx                                          # (K, N)
        # argmin over tiny K axis: K-1 unrolled VPU compare/selects on
        # lane-dense (1, N) rows (strict '<' -> first-index tie-breaking).
        best = dist[0:1, :]
        labels = jnp.zeros((1, N), jnp.int32)
        for k in range(1, K):
            dk = dist[k:k + 1, :]
            better = dk < best
            labels = jnp.where(better, k, labels)
            best = jnp.where(better, dk, best)

        # ---- update: one matmul gives sums (first C cols) AND counts (last
        # col, via the mask channel); padded tokens contribute nothing.
        one_hot = (labels == row).astype(jnp.bfloat16)                # (K, N)
        sc = lax.dot_general(one_hot, xb, (((1,), (1,)), ((), ())),
                             preferred_element_type=jnp.float32)      # (K, C+1)
        counts = sc[:, C:Caug]                                        # (K, 1)
        inv = pl.reciprocal(jnp.maximum(counts, 1.0), approx=True)    # EUP
        means = sc * inv                                              # (K, C+1)
        cent_new = jnp.where(counts > 0.0, means, cent)   # keep old if empty
        return cent_new, labels, sc

    xs = [x_ref[b] for b in range(Bt)]                     # (C+1, N) bf16 each

    def body(_, carry):
        # Bt independent per-sample chains emitted back-to-back -> the
        # scheduler interleaves them into the MXU/VPU latency bubbles.
        return tuple(step_sample(xs[b], carry[b][0]) for b in range(Bt))

    carry0 = tuple(init_state(xs[b]) for b in range(Bt))
    final = lax.fori_loop(0, num_iters, body, carry0, unroll=True)

    # Community means for the emitted labels; empty community -> zeros
    # (matches torch.zeros(C) in the PyTorch forward).
    for b in range(Bt):
        _, labels, sc = final[b]
        counts = sc[:, C:Caug]
        inv = pl.reciprocal(jnp.maximum(counts, 1.0), approx=True)
        means = sc[:, :C] * inv                                       # (K, C)
        clustered = jnp.where(counts > 0.0, means, jnp.zeros_like(means))
        cent_ref[b] = clustered.astype(cent_ref.dtype)
        label_ref[b] = labels                                         # (1, N)


def _pick_block_batch(B, bytes_per_sample, vmem_cap):
    """Choose how many samples to interleave per grid step.

    Keep >= 4 grid steps when possible (>= 2 per TensorCore on v7x) so the
    B axis still shards across cores and cross-step DMA pipelining survives,
    and keep the double-buffered input block well inside the VMEM budget.
    """
    budget = int(vmem_cap * 0.4)
    for bt in (4, 3, 2):
        if B % bt == 0 and B // bt >= 4 and 2 * bt * bytes_per_sample <= budget:
            return bt
    if B % 2 == 0 and B // 2 >= 2 and 4 * bytes_per_sample <= budget:
        return 2
    return 1


def kmeans_cluster_forward(feature_map, num_clusters=NUM_CLUSTERS,
                           num_iters=NUM_ITERS):
    """feature_map: (B, C, H, W) float32 -> (B, num_clusters, C), (B, H*W)."""
    B, C, H, W = feature_map.shape
    N = H * W
    N_pad = ((N + 127) // 128) * 128

    # (B, C, H, W) -> (B, C, N): pure reshape (no transpose), bf16 so the
    # HBM->VMEM DMA halves.  Append the valid-token mask channel; zero-pad the
    # token axis to a lane-dense multiple of 128 (padded columns are all-zero
    # including the mask, so they are ignored by sums/counts).
    x = feature_map.reshape(B, C, N).astype(jnp.bfloat16)
    mask = jnp.ones((B, 1, N), jnp.bfloat16)
    x_aug = jnp.concatenate([x, mask], axis=1)                 # (B, C+1, N)
    if N_pad != N:
        x_aug = jnp.pad(x_aug, ((0, 0), (0, 0), (0, N_pad - N)))
    Caug = C + 1

    try:
        vmem_cap = pltpu.get_tpu_info().vmem_capacity_bytes    # 64 MiB on v7x
    except Exception:
        vmem_cap = 64 << 20

    bytes_per_sample = Caug * N_pad * 2                        # bf16 block
    Bt = _pick_block_batch(B, bytes_per_sample, vmem_cap)

    kernel = functools.partial(_kmeans_kernel,
                               num_clusters=num_clusters,
                               num_iters=num_iters,
                               valid_n=N)

    # VMEM budget: double-buffered input AND output blocks + in-kernel
    # temporaries (dist / one_hot ~ K*N f32 each per interleaved sample,
    # centroid/sum tiles) + compiler-scratch headroom, clamped to the chip.
    in_bytes = Bt * bytes_per_sample
    out_bytes = Bt * (num_clusters * C * 4 + N_pad * 4)
    temp_bytes = Bt * (4 * num_clusters * N_pad * 4
                       + 4 * num_clusters * Caug * 4)
    need = 2 * (in_bytes + out_bytes) + temp_bytes + (4 << 20)
    vmem_limit = max(16 << 20, min(need, int(vmem_cap * 0.85)))

    clustered, labels = pl.pallas_call(
        kernel,
        out_shape=(
            jax.ShapeDtypeStruct((B, num_clusters, C), jnp.float32),
            jax.ShapeDtypeStruct((B, 1, N_pad), jnp.int32),
        ),
        grid_spec=pltpu.PrefetchScalarGridSpec(
            num_scalar_prefetch=0,
            grid=(B // Bt,),
            in_specs=[pl.BlockSpec((Bt, Caug, N_pad), lambda i: (i, 0, 0))],
            out_specs=(
                pl.BlockSpec((Bt, num_clusters, C), lambda i: (i, 0, 0)),
                pl.BlockSpec((Bt, 1, N_pad), lambda i: (i, 0, 0)),
            ),
        ),
        compiler_params=pltpu.CompilerParams(
            dimension_semantics=("parallel",),   # B axis shards across TCs
            vmem_limit_bytes=vmem_limit),
    )(x_aug)

    return clustered, labels[:, 0, :N]


if __name__ == "__main__":
    key = jax.random.PRNGKey(0)
    B, C, H, W = 2, 4, 16, 16
    feature_map = jax.random.normal(key, (B, C, H, W), dtype=jnp.float32)

    clustered_features, communities = kmeans_cluster_forward(feature_map)
    jax.block_until_ready((clustered_features, communities))

    assert clustered_features.shape == (B, NUM_CLUSTERS, C)
    assert communities.shape == (B, H * W)
    assert bool(jnp.all(jnp.isfinite(clustered_features)))
    assert bool(jnp.all((communities >= 0) & (communities < NUM_CLUSTERS)))

    print("KERNEL_OK")
</pallas_src>

<mosaic_0001>
module attributes {stable_mosaic.version = 11 : i64} {
  func.func @_kmeans_kernel(%arg0: i32, %arg1: memref<1x5x256xbf16, #tpu.memory_space<vmem>>, %arg2: memref<1x3x4xf32, #tpu.memory_space<vmem>>, %arg3: memref<1x1x256xi32, #tpu.memory_space<vmem>>) attributes {dimension_semantics = [#tpu.dimension_semantics<parallel>], iteration_bounds = array<i64: 2>, scalar_prefetch = 0 : i64, scratch_operands = 0 : i64, tpu.core_type = #tpu.core_type<tc>, window_params = [{transform_indices = @transform_0, window_bounds = array<i64: 1, 5, 256>}, {transform_indices = @transform_1, window_bounds = array<i64: 1, 3, 4>}, {transform_indices = @transform_2, window_bounds = array<i64: 1, 1, 256>}]} {
    %0 = tpu.iota {dimensions = array<i32: 0>} : vector<3x256xi32>
    %1 = tpu.iota {dimensions = array<i32: 1>} : vector<3x256xi32>
    %c85_i32 = arith.constant 85 : i32
    %2 = vector.broadcast %c85_i32 : i32 to vector<3x256xi32>
    %3 = arith.muli %0, %2 : vector<3x256xi32>
    %4 = arith.cmpi eq, %1, %3 : vector<3x256xi32>
    %5 = arith.extui %4 : vector<3x256xi1> to vector<3x256xi32>
    %6 = arith.sitofp %5 : vector<3x256xi32> to vector<3x256xf32>
    %7 = arith.truncf %6 : vector<3x256xf32> to vector<3x256xbf16>
    %c0 = arith.constant 0 : index
    %c0_0 = arith.constant 0 : index
    %c0_1 = arith.constant 0 : index
    %8 = vector.load %arg1[%c0, %c0_0, %c0_1] : memref<1x5x256xbf16, #tpu.memory_space<vmem>>, vector<1x5x256xbf16>
    %9 = vector.shape_cast %8 : vector<1x5x256xbf16> to vector<5x256xbf16>
    %cst = arith.constant dense<0.000000e+00> : vector<3x5xf32>
    %10 = tpu.matmul %7, %9, %cst {dimension_numbers = #tpu.dot_dimension_numbers<[1], [1], [0], [0], [0, 0, 1, 0], [], []>} : vector<3x256xbf16>, vector<5x256xbf16>, vector<3x5xf32> -> vector<3x5xf32>
    %c0_i32 = arith.constant 0 : i32
    %11 = vector.broadcast %c0_i32 : i32 to vector<1x256xi32>
    %cst_2 = arith.constant 0.000000e+00 : f32
    %12 = vector.broadcast %cst_2 : f32 to vector<3x5xf32>
    %c0_i32_3 = arith.constant 0 : i32
    %13 = arith.truncf %10 : vector<3x5xf32> to vector<3x5xbf16>
    %cst_4 = arith.constant dense<0.000000e+00> : vector<3x256xf32>
    %14 = tpu.matmul %13, %9, %cst_4 {dimension_numbers = #tpu.dot_dimension_numbers<[1], [0], [0], [1], [0, 0, 1, 1], [], []>} : vector<3x5xbf16>, vector<5x256xbf16>, vector<3x256xf32> -> vector<3x256xf32>
    %15 = arith.extf %13 : vector<3x5xbf16> to vector<3x5xf32>
    %16 = arith.mulf %15, %15 : vector<3x5xf32>
    %cst_5 = arith.constant dense<0.000000e+00> : vector<3xf32>
    %17 = vector.multi_reduction <add>, %16, %cst_5 [1] : vector<3x5xf32> to vector<3xf32>
    %18 = vector.shape_cast %17 : vector<3xf32> to vector<3x1xf32>
    %cst_6 = arith.constant 2.000000e+00 : f32
    %19 = vector.broadcast %cst_6 : f32 to vector<3x256xf32>
    %20 = arith.mulf %19, %14 : vector<3x256xf32>
    %21 = vector.broadcast %18 : vector<3x1xf32> to vector<3x256xf32>
    %22 = arith.subf %21, %20 : vector<3x256xf32>
    %23 = vector.extract_strided_slice %22 {offsets = [0, 0], sizes = [1, 256], strides = [1, 1]} : vector<3x256xf32> to vector<1x256xf32>
    %c0_i32_7 = arith.constant 0 : i32
    %24 = vector.broadcast %c0_i32_7 : i32 to vector<1x256xi32>
    %25 = vector.extract_strided_slice %22 {offsets = [1, 0], sizes = [1, 256], strides = [1, 1]} : vector<3x256xf32> to vector<1x256xf32>
    %26 = arith.cmpf olt, %25, %23 : vector<1x256xf32>
    %c1_i32 = arith.constant 1 : i32
    %27 = vector.broadcast %c1_i32 : i32 to vector<1x256xi32>
    %28 = arith.select %26, %27, %24 : vector<1x256xi1>, vector<1x256xi32>
    %29 = arith.select %26, %25, %23 : vector<1x256xi1>, vector<1x256xf32>
    %30 = vector.extract_strided_slice %22 {offsets = [2, 0], sizes = [1, 256], strides = [1, 1]} : vector<3x256xf32> to vector<1x256xf32>
    %31 = arith.cmpf olt, %30, %29 : vector<1x256xf32>
    %c2_i32 = arith.constant 2 : i32
    %32 = vector.broadcast %c2_i32 : i32 to vector<1x256xi32>
    %33 = arith.select %31, %32, %28 : vector<1x256xi1>, vector<1x256xi32>
    %34 = vector.broadcast %33 : vector<1x256xi32> to vector<3x256xi32>
    %35 = arith.cmpi eq, %34, %0 : vector<3x256xi32>
    %36 = arith.extui %35 : vector<3x256xi1> to vector<3x256xi32>
    %37 = arith.sitofp %36 : vector<3x256xi32> to vector<3x256xf32>
    %38 = arith.truncf %37 : vector<3x256xf32> to vector<3x256xbf16>
    %cst_8 = arith.constant dense<0.000000e+00> : vector<3x5xf32>
    %39 = tpu.matmul %38, %9, %cst_8 {dimension_numbers = #tpu.dot_dimension_numbers<[1], [1], [0], [0], [0, 0, 1, 0], [], []>} : vector<3x256xbf16>, vector<5x256xbf16>, vector<3x5xf32> -> vector<3x5xf32>
    %40 = vector.extract_strided_slice %39 {offsets = [0, 4], sizes = [3, 1], strides = [1, 1]} : vector<3x5xf32> to vector<3x1xf32>
    %cst_9 = arith.constant 1.000000e+00 : f32
    %41 = vector.broadcast %cst_9 : f32 to vector<3x1xf32>
    %42 = arith.maximumf %40, %41 : vector<3x1xf32>
    %43 = tpu.reciprocal %42 {approx = true} : vector<3x1xf32> -> vector<3x1xf32>
    %44 = vector.broadcast %43 : vector<3x1xf32> to vector<3x5xf32>
    %45 = arith.mulf %39, %44 : vector<3x5xf32>
    %cst_10 = arith.constant 0.000000e+00 : f32
    %46 = vector.broadcast %cst_10 : f32 to vector<3x1xf32>
    %47 = arith.cmpf ogt, %40, %46 : vector<3x1xf32>
    %48 = vector.shape_cast %47 : vector<3x1xi1> to vector<3x1xi1>
    %49 = vector.broadcast %48 : vector<3x1xi1> to vector<3x5xi1>
    %50 = arith.select %49, %45, %10 : vector<3x5xi1>, vector<3x5xf32>
    %c1_i32_11 = arith.constant 1 : i32
    %51 = arith.truncf %50 : vector<3x5xf32> to vector<3x5xbf16>
    %cst_12 = arith.constant dense<0.000000e+00> : vector<3x256xf32>
    %52 = tpu.matmul %51, %9, %cst_12 {dimension_numbers = #tpu.dot_dimension_numbers<[1], [0], [0], [1], [0, 0, 1, 1], [], []>} : vector<3x5xbf16>, vector<5x256xbf16>, vector<3x256xf32> -> vector<3x256xf32>
    %53 = arith.extf %51 : vector<3x5xbf16> to vector<3x5xf32>
    %54 = arith.mulf %53, %53 : vector<3x5xf32>
    %cst_13 = arith.constant dense<0.000000e+00> : vector<3xf32>
    %55 = vector.multi_reduction <add>, %54, %cst_13 [1] : vector<3x5xf32> to vector<3xf32>
    %56 = vector.shape_cast %55 : vector<3xf32> to vector<3x1xf32>
    %cst_14 = arith.constant 2.000000e+00 : f32
    %57 = vector.broadcast %cst_14 : f32 to vector<3x256xf32>
    %58 = arith.mulf %57, %52 : vector<3x256xf32>
    %59 = vector.broadcast %56 : vector<3x1xf32> to vector<3x256xf32>
    %60 = arith.subf %59, %58 : vector<3x256xf32>
    %61 = vector.extract_strided_slice %60 {offsets = [0, 0], sizes = [1, 256], strides = [1, 1]} : vector<3x256xf32> to vector<1x256xf32>
    %c0_i32_15 = arith.constant 0 : i32
    %62 = vector.broadcast %c0_i32_15 : i32 to vector<1x256xi32>
    %63 = vector.extract_strided_slice %60 {offsets = [1, 0], sizes = [1, 256], strides = [1, 1]} : vector<3x256xf32> to vector<1x256xf32>
    %64 = arith.cmpf olt, %63, %61 : vector<1x256xf32>
    %c1_i32_16 = arith.constant 1 : i32
    %65 = vector.broadcast %c1_i32_16 : i32 to vector<1x256xi32>
    %66 = arith.select %64, %65, %62 : vector<1x256xi1>, vector<1x256xi32>
    %67 = arith.select %64, %63, %61 : vector<1x256xi1>, vector<1x256xf32>
    %68 = vector.extract_strided_slice %60 {offsets = [2, 0], sizes = [1, 256], strides = [1, 1]} : vector<3x256xf32> to vector<1x256xf32>
    %69 = arith.cmpf olt, %68, %67 : vector<1x256xf32>
    %c2_i32_17 = arith.constant 2 : i32
    %70 = vector.broadcast %c2_i32_17 : i32 to vector<1x256xi32>
    %71 = arith.select %69, %70, %66 : vector<1x256xi1>, vector<1x256xi32>
    %72 = vector.broadcast %71 : vector<1x256xi32> to vector<3x256xi32>
    %73 = arith.cmpi eq, %72, %0 : vector<3x256xi32>
    %74 = arith.extui %73 : vector<3x256xi1> to vector<3x256xi32>
    %75 = arith.sitofp %74 : vector<3x256xi32> to vector<3x256xf32>
    %76 = arith.truncf %75 : vector<3x256xf32> to vector<3x256xbf16>
    %cst_18 = arith.constant dense<0.000000e+00> : vector<3x5xf32>
    %77 = tpu.matmul %76, %9, %cst_18 {dimension_numbers = #tpu.dot_dimension_numbers<[1], [1], [0], [0], [0, 0, 1, 0], [], []>} : vector<3x256xbf16>, vector<5x256xbf16>, vector<3x5xf32> -> vector<3x5xf32>
    %78 = vector.extract_strided_slice %77 {offsets = [0, 4], sizes = [3, 1], strides = [1, 1]} : vector<3x5xf32> to vector<3x1xf32>
    %cst_19 = arith.constant 1.000000e+00 : f32
    %79 = vector.broadcast %cst_19 : f32 to vector<3x1xf32>
    %80 = arith.maximumf %78, %79 : vector<3x1xf32>
    %81 = tpu.reciprocal %80 {approx = true} : vector<3x1xf32> -> vector<3x1xf32>
    %82 = vector.broadcast %81 : vector<3x1xf32> to vector<3x5xf32>
    %83 = arith.mulf %77, %82 : vector<3x5xf32>
    %cst_20 = arith.constant 0.000000e+00 : f32
    %84 = vector.broadcast %cst_20 : f32 to vector<3x1xf32>
    %85 = arith.cmpf ogt, %78, %84 : vector<3x1xf32>
    %86 = vector.shape_cast %85 : vector<3x1xi1> to vector<3x1xi1>
    %87 = vector.broadcast %86 : vector<3x1xi1> to vector<3x5xi1>
    %88 = arith.select %87, %83, %50 : vector<3x5xi1>, vector<3x5xf32>
    %c2_i32_21 = arith.constant 2 : i32
    %89 = arith.truncf %88 : vector<3x5xf32> to vector<3x5xbf16>
    %cst_22 = arith.constant dense<0.000000e+00> : vector<3x256xf32>
    %90 = tpu.matmul %89, %9, %cst_22 {dimension_numbers = #tpu.dot_dimension_numbers<[1], [0], [0], [1], [0, 0, 1, 1], [], []>} : vector<3x5xbf16>, vector<5x256xbf16>, vector<3x256xf32> -> vector<3x256xf32>
    %91 = arith.extf %89 : vector<3x5xbf16> to vector<3x5xf32>
    %92 = arith.mulf %91, %91 : vector<3x5xf32>
    %cst_23 = arith.constant dense<0.000000e+00> : vector<3xf32>
    %93 = vector.multi_reduction <add>, %92, %cst_23 [1] : vector<3x5xf32> to vector<3xf32>
    %94 = vector.shape_cast %93 : vector<3xf32> to vector<3x1xf32>
    %cst_24 = arith.constant 2.000000e+00 : f32
    %95 = vector.broadcast %cst_24 : f32 to vector<3x256xf32>
    %96 = arith.mulf %95, %90 : vector<3x256xf32>
    %97 = vector.broadcast %94 : vector<3x1xf32> to vector<3x256xf32>
    %98 = arith.subf %97, %96 : vector<3x256xf32>
    %99 = vector.extract_strided_slice %98 {offsets = [0, 0], sizes = [1, 256], strides = [1, 1]} : vector<3x256xf32> to vector<1x256xf32>
    %c0_i32_25 = arith.constant 0 : i32
    %100 = vector.broadcast %c0_i32_25 : i32 to vector<1x256xi32>
    %101 = vector.extract_strided_slice %98 {offsets = [1, 0], sizes = [1, 256], strides = [1, 1]} : vector<3x256xf32> to vector<1x256xf32>
    %102 = arith.cmpf olt, %101, %99 : vector<1x256xf32>
    %c1_i32_26 = arith.constant 1 : i32
    %103 = vector.broadcast %c1_i32_26 : i32 to vector<1x256xi32>
    %104 = arith.select %102, %103, %100 : vector<1x256xi1>, vector<1x256xi32>
    %105 = arith.select %102, %101, %99 : vector<1x256xi1>, vector<1x256xf32>
    %106 = vector.extract_strided_slice %98 {offsets = [2, 0], sizes = [1, 256], strides = [1, 1]} : vector<3x256xf32> to vector<1x256xf32>
    %107 = arith.cmpf olt, %106, %105 : vector<1x256xf32>
    %c2_i32_27 = arith.constant 2 : i32
    %108 = vector.broadcast %c2_i32_27 : i32 to vector<1x256xi32>
    %109 = arith.select %107, %108, %104 : vector<1x256xi1>, vector<1x256xi32>
    %110 = vector.broadcast %109 : vector<1x256xi32> to vector<3x256xi32>
    %111 = arith.cmpi eq, %110, %0 : vector<3x256xi32>
    %112 = arith.extui %111 : vector<3x256xi1> to vector<3x256xi32>
    %113 = arith.sitofp %112 : vector<3x256xi32> to vector<3x256xf32>
    %114 = arith.truncf %113 : vector<3x256xf32> to vector<3x256xbf16>
    %cst_28 = arith.constant dense<0.000000e+00> : vector<3x5xf32>
    %115 = tpu.matmul %114, %9, %cst_28 {dimension_numbers = #tpu.dot_dimension_numbers<[1], [1], [0], [0], [0, 0, 1, 0], [], []>} : vector<3x256xbf16>, vector<5x256xbf16>, vector<3x5xf32> -> vector<3x5xf32>
    %116 = vector.extract_strided_slice %115 {offsets = [0, 4], sizes = [3, 1], strides = [1, 1]} : vector<3x5xf32> to vector<3x1xf32>
    %cst_29 = arith.constant 1.000000e+00 : f32
    %117 = vector.broadcast %cst_29 : f32 to vector<3x1xf32>
    %118 = arith.maximumf %116, %117 : vector<3x1xf32>
    %119 = tpu.reciprocal %118 {approx = true} : vector<3x1xf32> -> vector<3x1xf32>
    %120 = vector.broadcast %119 : vector<3x1xf32> to vector<3x5xf32>
    %121 = arith.mulf %115, %120 : vector<3x5xf32>
    %cst_30 = arith.constant 0.000000e+00 : f32
    %122 = vector.broadcast %cst_30 : f32 to vector<3x1xf32>
    %123 = arith.cmpf ogt, %116, %122 : vector<3x1xf32>
    %124 = vector.shape_cast %123 : vector<3x1xi1> to vector<3x1xi1>
    %125 = vector.broadcast %124 : vector<3x1xi1> to vector<3x5xi1>
    %126 = arith.select %125, %121, %88 : vector<3x5xi1>, vector<3x5xf32>
    %c3_i32 = arith.constant 3 : i32
    %127 = arith.truncf %126 : vector<3x5xf32> to vector<3x5xbf16>
    %cst_31 = arith.constant dense<0.000000e+00> : vector<3x256xf32>
    %128 = tpu.matmul %127, %9, %cst_31 {dimension_numbers = #tpu.dot_dimension_numbers<[1], [0], [0], [1], [0, 0, 1, 1], [], []>} : vector<3x5xbf16>, vector<5x256xbf16>, vector<3x256xf32> -> vector<3x256xf32>
    %129 = arith.extf %127 : vector<3x5xbf16> to vector<3x5xf32>
    %130 = arith.mulf %129, %129 : vector<3x5xf32>
    %cst_32 = arith.constant dense<0.000000e+00> : vector<3xf32>
    %131 = vector.multi_reduction <add>, %130, %cst_32 [1] : vector<3x5xf32> to vector<3xf32>
    %132 = vector.shape_cast %131 : vector<3xf32> to vector<3x1xf32>
    %cst_33 = arith.constant 2.000000e+00 : f32
    %133 = vector.broadcast %cst_33 : f32 to vector<3x256xf32>
    %134 = arith.mulf %133, %128 : vector<3x256xf32>
    %135 = vector.broadcast %132 : vector<3x1xf32> to vector<3x256xf32>
    %136 = arith.subf %135, %134 : vector<3x256xf32>
    %137 = vector.extract_strided_slice %136 {offsets = [0, 0], sizes = [1, 256], strides = [1, 1]} : vector<3x256xf32> to vector<1x256xf32>
    %c0_i32_34 = arith.constant 0 : i32
    %138 = vector.broadcast %c0_i32_34 : i32 to vector<1x256xi32>
    %139 = vector.extract_strided_slice %136 {offsets = [1, 0], sizes = [1, 256], strides = [1, 1]} : vector<3x256xf32> to vector<1x256xf32>
    %140 = arith.cmpf olt, %139, %137 : vector<1x256xf32>
    %c1_i32_35 = arith.constant 1 : i32
    %141 = vector.broadcast %c1_i32_35 : i32 to vector<1x256xi32>
    %142 = arith.select %140, %141, %138 : vector<1x256xi1>, vector<1x256xi32>
    %143 = arith.select %140, %139, %137 : vector<1x256xi1>, vector<1x256xf32>
    %144 = vector.extract_strided_slice %136 {offsets = [2, 0], sizes = [1, 256], strides = [1, 1]} : vector<3x256xf32> to vector<1x256xf32>
    %145 = arith.cmpf olt, %144, %143 : vector<1x256xf32>
    %c2_i32_36 = arith.constant 2 : i32
    %146 = vector.broadcast %c2_i32_36 : i32 to vector<1x256xi32>
    %147 = arith.select %145, %146, %142 : vector<1x256xi1>, vector<1x256xi32>
    %148 = vector.broadcast %147 : vector<1x256xi32> to vector<3x256xi32>
    %149 = arith.cmpi eq, %148, %0 : vector<3x256xi32>
    %150 = arith.extui %149 : vector<3x256xi1> to vector<3x256xi32>
    %151 = arith.sitofp %150 : vector<3x256xi32> to vector<3x256xf32>
    %152 = arith.truncf %151 : vector<3x256xf32> to vector<3x256xbf16>
    %cst_37 = arith.constant dense<0.000000e+00> : vector<3x5xf32>
    %153 = tpu.matmul %152, %9, %cst_37 {dimension_numbers = #tpu.dot_dimension_numbers<[1], [1], [0], [0], [0, 0, 1, 0], [], []>} : vector<3x256xbf16>, vector<5x256xbf16>, vector<3x5xf32> -> vector<3x5xf32>
    %154 = vector.extract_strided_slice %153 {offsets = [0, 4], sizes = [3, 1], strides = [1, 1]} : vector<3x5xf32> to vector<3x1xf32>
    %cst_38 = arith.constant 1.000000e+00 : f32
    %155 = vector.broadcast %cst_38 : f32 to vector<3x1xf32>
    %156 = arith.maximumf %154, %155 : vector<3x1xf32>
    %157 = tpu.reciprocal %156 {approx = true} : vector<3x1xf32> -> vector<3x1xf32>
    %158 = vector.broadcast %157 : vector<3x1xf32> to vector<3x5xf32>
    %159 = arith.mulf %153, %158 : vector<3x5xf32>
    %cst_39 = arith.constant 0.000000e+00 : f32
    %160 = vector.broadcast %cst_39 : f32 to vector<3x1xf32>
    %161 = arith.cmpf ogt, %154, %160 : vector<3x1xf32>
    %162 = vector.shape_cast %161 : vector<3x1xi1> to vector<3x1xi1>
    %163 = vector.broadcast %162 : vector<3x1xi1> to vector<3x5xi1>
    %164 = arith.select %163, %159, %126 : vector<3x5xi1>, vector<3x5xf32>
    %c4_i32 = arith.constant 4 : i32
    %165 = arith.truncf %164 : vector<3x5xf32> to vector<3x5xbf16>
    %cst_40 = arith.constant dense<0.000000e+00> : vector<3x256xf32>
    %166 = tpu.matmul %165, %9, %cst_40 {dimension_numbers = #tpu.dot_dimension_numbers<[1], [0], [0], [1], [0, 0, 1, 1], [], []>} : vector<3x5xbf16>, vector<5x256xbf16>, vector<3x256xf32> -> vector<3x256xf32>
    %167 = arith.extf %165 : vector<3x5xbf16> to vector<3x5xf32>
    %168 = arith.mulf %167, %167 : vector<3x5xf32>
    %cst_41 = arith.constant dense<0.000000e+00> : vector<3xf32>
    %169 = vector.multi_reduction <add>, %168, %cst_41 [1] : vector<3x5xf32> to vector<3xf32>
    %170 = vector.shape_cast %169 : vector<3xf32> to vector<3x1xf32>
    %cst_42 = arith.constant 2.000000e+00 : f32
    %171 = vector.broadcast %cst_42 : f32 to vector<3x256xf32>
    %172 = arith.mulf %171, %166 : vector<3x256xf32>
    %173 = vector.broadcast %170 : vector<3x1xf32> to vector<3x256xf32>
    %174 = arith.subf %173, %172 : vector<3x256xf32>
    %175 = vector.extract_strided_slice %174 {offsets = [0, 0], sizes = [1, 256], strides = [1, 1]} : vector<3x256xf32> to vector<1x256xf32>
    %c0_i32_43 = arith.constant 0 : i32
    %176 = vector.broadcast %c0_i32_43 : i32 to vector<1x256xi32>
    %177 = vector.extract_strided_slice %174 {offsets = [1, 0], sizes = [1, 256], strides = [1, 1]} : vector<3x256xf32> to vector<1x256xf32>
    %178 = arith.cmpf olt, %177, %175 : vector<1x256xf32>
    %c1_i32_44 = arith.constant 1 : i32
    %179 = vector.broadcast %c1_i32_44 : i32 to vector<1x256xi32>
    %180 = arith.select %178, %179, %176 : vector<1x256xi1>, vector<1x256xi32>
    %181 = arith.select %178, %177, %175 : vector<1x256xi1>, vector<1x256xf32>
    %182 = vector.extract_strided_slice %174 {offsets = [2, 0], sizes = [1, 256], strides = [1, 1]} : vector<3x256xf32> to vector<1x256xf32>
    %183 = arith.cmpf olt, %182, %181 : vector<1x256xf32>
    %c2_i32_45 = arith.constant 2 : i32
    %184 = vector.broadcast %c2_i32_45 : i32 to vector<1x256xi32>
    %185 = arith.select %183, %184, %180 : vector<1x256xi1>, vector<1x256xi32>
    %186 = vector.broadcast %185 : vector<1x256xi32> to vector<3x256xi32>
    %187 = arith.cmpi eq, %186, %0 : vector<3x256xi32>
    %188 = arith.extui %187 : vector<3x256xi1> to vector<3x256xi32>
    %189 = arith.sitofp %188 : vector<3x256xi32> to vector<3x256xf32>
    %190 = arith.truncf %189 : vector<3x256xf32> to vector<3x256xbf16>
    %cst_46 = arith.constant dense<0.000000e+00> : vector<3x5xf32>
    %191 = tpu.matmul %190, %9, %cst_46 {dimension_numbers = #tpu.dot_dimension_numbers<[1], [1], [0], [0], [0, 0, 1, 0], [], []>} : vector<3x256xbf16>, vector<5x256xbf16>, vector<3x5xf32> -> vector<3x5xf32>
    %192 = vector.extract_strided_slice %191 {offsets = [0, 4], sizes = [3, 1], strides = [1, 1]} : vector<3x5xf32> to vector<3x1xf32>
    %cst_47 = arith.constant 1.000000e+00 : f32
    %193 = vector.broadcast %cst_47 : f32 to vector<3x1xf32>
    %194 = arith.maximumf %192, %193 : vector<3x1xf32>
    %195 = tpu.reciprocal %194 {approx = true} : vector<3x1xf32> -> vector<3x1xf32>
    %196 = vector.broadcast %195 : vector<3x1xf32> to vector<3x5xf32>
    %197 = arith.mulf %191, %196 : vector<3x5xf32>
    %cst_48 = arith.constant 0.000000e+00 : f32
    %198 = vector.broadcast %cst_48 : f32 to vector<3x1xf32>
    %199 = arith.cmpf ogt, %192, %198 : vector<3x1xf32>
    %200 = vector.shape_cast %199 : vector<3x1xi1> to vector<3x1xi1>
    %201 = vector.broadcast %200 : vector<3x1xi1> to vector<3x5xi1>
    %202 = arith.select %201, %197, %164 : vector<3x5xi1>, vector<3x5xf32>
    %c5_i32 = arith.constant 5 : i32
    %203 = arith.truncf %202 : vector<3x5xf32> to vector<3x5xbf16>
    %cst_49 = arith.constant dense<0.000000e+00> : vector<3x256xf32>
    %204 = tpu.matmul %203, %9, %cst_49 {dimension_numbers = #tpu.dot_dimension_numbers<[1], [0], [0], [1], [0, 0, 1, 1], [], []>} : vector<3x5xbf16>, vector<5x256xbf16>, vector<3x256xf32> -> vector<3x256xf32>
    %205 = arith.extf %203 : vector<3x5xbf16> to vector<3x5xf32>
    %206 = arith.mulf %205, %205 : vector<3x5xf32>
    %cst_50 = arith.constant dense<0.000000e+00> : vector<3xf32>
    %207 = vector.multi_reduction <add>, %206, %cst_50 [1] : vector<3x5xf32> to vector<3xf32>
    %208 = vector.shape_cast %207 : vector<3xf32> to vector<3x1xf32>
    %cst_51 = arith.constant 2.000000e+00 : f32
    %209 = vector.broadcast %cst_51 : f32 to vector<3x256xf32>
    %210 = arith.mulf %209, %204 : vector<3x256xf32>
    %211 = vector.broadcast %208 : vector<3x1xf32> to vector<3x256xf32>
    %212 = arith.subf %211, %210 : vector<3x256xf32>
    %213 = vector.extract_strided_slice %212 {offsets = [0, 0], sizes = [1, 256], strides = [1, 1]} : vector<3x256xf32> to vector<1x256xf32>
    %c0_i32_52 = arith.constant 0 : i32
    %214 = vector.broadcast %c0_i32_52 : i32 to vector<1x256xi32>
    %215 = vector.extract_strided_slice %212 {offsets = [1, 0], sizes = [1, 256], strides = [1, 1]} : vector<3x256xf32> to vector<1x256xf32>
    %216 = arith.cmpf olt, %215, %213 : vector<1x256xf32>
    %c1_i32_53 = arith.constant 1 : i32
    %217 = vector.broadcast %c1_i32_53 : i32 to vector<1x256xi32>
    %218 = arith.select %216, %217, %214 : vector<1x256xi1>, vector<1x256xi32>
    %219 = arith.select %216, %215, %213 : vector<1x256xi1>, vector<1x256xf32>
    %220 = vector.extract_strided_slice %212 {offsets = [2, 0], sizes = [1, 256], strides = [1, 1]} : vector<3x256xf32> to vector<1x256xf32>
    %221 = arith.cmpf olt, %220, %219 : vector<1x256xf32>
    %c2_i32_54 = arith.constant 2 : i32
    %222 = vector.broadcast %c2_i32_54 : i32 to vector<1x256xi32>
    %223 = arith.select %221, %222, %218 : vector<1x256xi1>, vector<1x256xi32>
    %224 = vector.broadcast %223 : vector<1x256xi32> to vector<3x256xi32>
    %225 = arith.cmpi eq, %224, %0 : vector<3x256xi32>
    %226 = arith.extui %225 : vector<3x256xi1> to vector<3x256xi32>
    %227 = arith.sitofp %226 : vector<3x256xi32> to vector<3x256xf32>
    %228 = arith.truncf %227 : vector<3x256xf32> to vector<3x256xbf16>
    %cst_55 = arith.constant dense<0.000000e+00> : vector<3x5xf32>
    %229 = tpu.matmul %228, %9, %cst_55 {dimension_numbers = #tpu.dot_dimension_numbers<[1], [1], [0], [0], [0, 0, 1, 0], [], []>} : vector<3x256xbf16>, vector<5x256xbf16>, vector<3x5xf32> -> vector<3x5xf32>
    %230 = vector.extract_strided_slice %229 {offsets = [0, 4], sizes = [3, 1], strides = [1, 1]} : vector<3x5xf32> to vector<3x1xf32>
    %cst_56 = arith.constant 1.000000e+00 : f32
    %231 = vector.broadcast %cst_56 : f32 to vector<3x1xf32>
    %232 = arith.maximumf %230, %231 : vector<3x1xf32>
    %233 = tpu.reciprocal %232 {approx = true} : vector<3x1xf32> -> vector<3x1xf32>
    %234 = vector.broadcast %233 : vector<3x1xf32> to vector<3x5xf32>
    %235 = arith.mulf %229, %234 : vector<3x5xf32>
    %cst_57 = arith.constant 0.000000e+00 : f32
    %236 = vector.broadcast %cst_57 : f32 to vector<3x1xf32>
    %237 = arith.cmpf ogt, %230, %236 : vector<3x1xf32>
    %238 = vector.shape_cast %237 : vector<3x1xi1> to vector<3x1xi1>
    %239 = vector.broadcast %238 : vector<3x1xi1> to vector<3x5xi1>
    %240 = arith.select %239, %235, %202 : vector<3x5xi1>, vector<3x5xf32>
    %c6_i32 = arith.constant 6 : i32
    %241 = arith.truncf %240 : vector<3x5xf32> to vector<3x5xbf16>
    %cst_58 = arith.constant dense<0.000000e+00> : vector<3x256xf32>
    %242 = tpu.matmul %241, %9, %cst_58 {dimension_numbers = #tpu.dot_dimension_numbers<[1], [0], [0], [1], [0, 0, 1, 1], [], []>} : vector<3x5xbf16>, vector<5x256xbf16>, vector<3x256xf32> -> vector<3x256xf32>
    %243 = arith.extf %241 : vector<3x5xbf16> to vector<3x5xf32>
    %244 = arith.mulf %243, %243 : vector<3x5xf32>
    %cst_59 = arith.constant dense<0.000000e+00> : vector<3xf32>
    %245 = vector.multi_reduction <add>, %244, %cst_59 [1] : vector<3x5xf32> to vector<3xf32>
    %246 = vector.shape_cast %245 : vector<3xf32> to vector<3x1xf32>
    %cst_60 = arith.constant 2.000000e+00 : f32
    %247 = vector.broadcast %cst_60 : f32 to vector<3x256xf32>
    %248 = arith.mulf %247, %242 : vector<3x256xf32>
    %249 = vector.broadcast %246 : vector<3x1xf32> to vector<3x256xf32>
    %250 = arith.subf %249, %248 : vector<3x256xf32>
    %251 = vector.extract_strided_slice %250 {offsets = [0, 0], sizes = [1, 256], strides = [1, 1]} : vector<3x256xf32> to vector<1x256xf32>
    %c0_i32_61 = arith.constant 0 : i32
    %252 = vector.broadcast %c0_i32_61 : i32 to vector<1x256xi32>
    %253 = vector.extract_strided_slice %250 {offsets = [1, 0], sizes = [1, 256], strides = [1, 1]} : vector<3x256xf32> to vector<1x256xf32>
    %254 = arith.cmpf olt, %253, %251 : vector<1x256xf32>
    %c1_i32_62 = arith.constant 1 : i32
    %255 = vector.broadcast %c1_i32_62 : i32 to vector<1x256xi32>
    %256 = arith.select %254, %255, %252 : vector<1x256xi1>, vector<1x256xi32>
    %257 = arith.select %254, %253, %251 : vector<1x256xi1>, vector<1x256xf32>
    %258 = vector.extract_strided_slice %250 {offsets = [2, 0], sizes = [1, 256], strides = [1, 1]} : vector<3x256xf32> to vector<1x256xf32>
    %259 = arith.cmpf olt, %258, %257 : vector<1x256xf32>
    %c2_i32_63 = arith.constant 2 : i32
    %260 = vector.broadcast %c2_i32_63 : i32 to vector<1x256xi32>
    %261 = arith.select %259, %260, %256 : vector<1x256xi1>, vector<1x256xi32>
    %262 = vector.broadcast %261 : vector<1x256xi32> to vector<3x256xi32>
    %263 = arith.cmpi eq, %262, %0 : vector<3x256xi32>
    %264 = arith.extui %263 : vector<3x256xi1> to vector<3x256xi32>
    %265 = arith.sitofp %264 : vector<3x256xi32> to vector<3x256xf32>
    %266 = arith.truncf %265 : vector<3x256xf32> to vector<3x256xbf16>
    %cst_64 = arith.constant dense<0.000000e+00> : vector<3x5xf32>
    %267 = tpu.matmul %266, %9, %cst_64 {dimension_numbers = #tpu.dot_dimension_numbers<[1], [1], [0], [0], [0, 0, 1, 0], [], []>} : vector<3x256xbf16>, vector<5x256xbf16>, vector<3x5xf32> -> vector<3x5xf32>
    %268 = vector.extract_strided_slice %267 {offsets = [0, 4], sizes = [3, 1], strides = [1, 1]} : vector<3x5xf32> to vector<3x1xf32>
    %cst_65 = arith.constant 1.000000e+00 : f32
    %269 = vector.broadcast %cst_65 : f32 to vector<3x1xf32>
    %270 = arith.maximumf %268, %269 : vector<3x1xf32>
    %271 = tpu.reciprocal %270 {approx = true} : vector<3x1xf32> -> vector<3x1xf32>
    %272 = vector.broadcast %271 : vector<3x1xf32> to vector<3x5xf32>
    %273 = arith.mulf %267, %272 : vector<3x5xf32>
    %cst_66 = arith.constant 0.000000e+00 : f32
    %274 = vector.broadcast %cst_66 : f32 to vector<3x1xf32>
    %275 = arith.cmpf ogt, %268, %274 : vector<3x1xf32>
    %276 = vector.shape_cast %275 : vector<3x1xi1> to vector<3x1xi1>
    %277 = vector.broadcast %276 : vector<3x1xi1> to vector<3x5xi1>
    %278 = arith.select %277, %273, %240 : vector<3x5xi1>, vector<3x5xf32>
    %c7_i32 = arith.constant 7 : i32
    %279 = arith.truncf %278 : vector<3x5xf32> to vector<3x5xbf16>
    %cst_67 = arith.constant dense<0.000000e+00> : vector<3x256xf32>
    %280 = tpu.matmul %279, %9, %cst_67 {dimension_numbers = #tpu.dot_dimension_numbers<[1], [0], [0], [1], [0, 0, 1, 1], [], []>} : vector<3x5xbf16>, vector<5x256xbf16>, vector<3x256xf32> -> vector<3x256xf32>
    %281 = arith.extf %279 : vector<3x5xbf16> to vector<3x5xf32>
    %282 = arith.mulf %281, %281 : vector<3x5xf32>
    %cst_68 = arith.constant dense<0.000000e+00> : vector<3xf32>
    %283 = vector.multi_reduction <add>, %282, %cst_68 [1] : vector<3x5xf32> to vector<3xf32>
    %284 = vector.shape_cast %283 : vector<3xf32> to vector<3x1xf32>
    %cst_69 = arith.constant 2.000000e+00 : f32
    %285 = vector.broadcast %cst_69 : f32 to vector<3x256xf32>
    %286 = arith.mulf %285, %280 : vector<3x256xf32>
    %287 = vector.broadcast %284 : vector<3x1xf32> to vector<3x256xf32>
    %288 = arith.subf %287, %286 : vector<3x256xf32>
    %289 = vector.extract_strided_slice %288 {offsets = [0, 0], sizes = [1, 256], strides = [1, 1]} : vector<3x256xf32> to vector<1x256xf32>
    %c0_i32_70 = arith.constant 0 : i32
    %290 = vector.broadcast %c0_i32_70 : i32 to vector<1x256xi32>
    %291 = vector.extract_strided_slice %288 {offsets = [1, 0], sizes = [1, 256], strides = [1, 1]} : vector<3x256xf32> to vector<1x256xf32>
    %292 = arith.cmpf olt, %291, %289 : vector<1x256xf32>
    %c1_i32_71 = arith.constant 1 : i32
    %293 = vector.broadcast %c1_i32_71 : i32 to vector<1x256xi32>
    %294 = arith.select %292, %293, %290 : vector<1x256xi1>, vector<1x256xi32>
    %295 = arith.select %292, %291, %289 : vector<1x256xi1>, vector<1x256xf32>
    %296 = vector.extract_strided_slice %288 {offsets = [2, 0], sizes = [1, 256], strides = [1, 1]} : vector<3x256xf32> to vector<1x256xf32>
    %297 = arith.cmpf olt, %296, %295 : vector<1x256xf32>
    %c2_i32_72 = arith.constant 2 : i32
    %298 = vector.broadcast %c2_i32_72 : i32 to vector<1x256xi32>
    %299 = arith.select %297, %298, %294 : vector<1x256xi1>, vector<1x256xi32>
    %300 = vector.broadcast %299 : vector<1x256xi32> to vector<3x256xi32>
    %301 = arith.cmpi eq, %300, %0 : vector<3x256xi32>
    %302 = arith.extui %301 : vector<3x256xi1> to vector<3x256xi32>
    %303 = arith.sitofp %302 : vector<3x256xi32> to vector<3x256xf32>
    %304 = arith.truncf %303 : vector<3x256xf32> to vector<3x256xbf16>
    %cst_73 = arith.constant dense<0.000000e+00> : vector<3x5xf32>
    %305 = tpu.matmul %304, %9, %cst_73 {dimension_numbers = #tpu.dot_dimension_numbers<[1], [1], [0], [0], [0, 0, 1, 0], [], []>} : vector<3x256xbf16>, vector<5x256xbf16>, vector<3x5xf32> -> vector<3x5xf32>
    %306 = vector.extract_strided_slice %305 {offsets = [0, 4], sizes = [3, 1], strides = [1, 1]} : vector<3x5xf32> to vector<3x1xf32>
    %cst_74 = arith.constant 1.000000e+00 : f32
    %307 = vector.broadcast %cst_74 : f32 to vector<3x1xf32>
    %308 = arith.maximumf %306, %307 : vector<3x1xf32>
    %309 = tpu.reciprocal %308 {approx = true} : vector<3x1xf32> -> vector<3x1xf32>
    %310 = vector.broadcast %309 : vector<3x1xf32> to vector<3x5xf32>
    %311 = arith.mulf %305, %310 : vector<3x5xf32>
    %cst_75 = arith.constant 0.000000e+00 : f32
    %312 = vector.broadcast %cst_75 : f32 to vector<3x1xf32>
    %313 = arith.cmpf ogt, %306, %312 : vector<3x1xf32>
    %314 = vector.shape_cast %313 : vector<3x1xi1> to vector<3x1xi1>
    %315 = vector.broadcast %314 : vector<3x1xi1> to vector<3x5xi1>
    %316 = arith.select %315, %311, %278 : vector<3x5xi1>, vector<3x5xf32>
    %c8_i32 = arith.constant 8 : i32
    %317 = arith.truncf %316 : vector<3x5xf32> to vector<3x5xbf16>
    %cst_76 = arith.constant dense<0.000000e+00> : vector<3x256xf32>
    %318 = tpu.matmul %317, %9, %cst_76 {dimension_numbers = #tpu.dot_dimension_numbers<[1], [0], [0], [1], [0, 0, 1, 1], [], []>} : vector<3x5xbf16>, vector<5x256xbf16>, vector<3x256xf32> -> vector<3x256xf32>
    %319 = arith.extf %317 : vector<3x5xbf16> to vector<3x5xf32>
    %320 = arith.mulf %319, %319 : vector<3x5xf32>
    %cst_77 = arith.constant dense<0.000000e+00> : vector<3xf32>
    %321 = vector.multi_reduction <add>, %320, %cst_77 [1] : vector<3x5xf32> to vector<3xf32>
    %322 = vector.shape_cast %321 : vector<3xf32> to vector<3x1xf32>
    %cst_78 = arith.constant 2.000000e+00 : f32
    %323 = vector.broadcast %cst_78 : f32 to vector<3x256xf32>
    %324 = arith.mulf %323, %318 : vector<3x256xf32>
    %325 = vector.broadcast %322 : vector<3x1xf32> to vector<3x256xf32>
    %326 = arith.subf %325, %324 : vector<3x256xf32>
    %327 = vector.extract_strided_slice %326 {offsets = [0, 0], sizes = [1, 256], strides = [1, 1]} : vector<3x256xf32> to vector<1x256xf32>
    %c0_i32_79 = arith.constant 0 : i32
    %328 = vector.broadcast %c0_i32_79 : i32 to vector<1x256xi32>
    %329 = vector.extract_strided_slice %326 {offsets = [1, 0], sizes = [1, 256], strides = [1, 1]} : vector<3x256xf32> to vector<1x256xf32>
    %330 = arith.cmpf olt, %329, %327 : vector<1x256xf32>
    %c1_i32_80 = arith.constant 1 : i32
    %331 = vector.broadcast %c1_i32_80 : i32 to vector<1x256xi32>
    %332 = arith.select %330, %331, %328 : vector<1x256xi1>, vector<1x256xi32>
    %333 = arith.select %330, %329, %327 : vector<1x256xi1>, vector<1x256xf32>
    %334 = vector.extract_strided_slice %326 {offsets = [2, 0], sizes = [1, 256], strides = [1, 1]} : vector<3x256xf32> to vector<1x256xf32>
    %335 = arith.cmpf olt, %334, %333 : vector<1x256xf32>
    %c2_i32_81 = arith.constant 2 : i32
    %336 = vector.broadcast %c2_i32_81 : i32 to vector<1x256xi32>
    %337 = arith.select %335, %336, %332 : vector<1x256xi1>, vector<1x256xi32>
    %338 = vector.broadcast %337 : vector<1x256xi32> to vector<3x256xi32>
    %339 = arith.cmpi eq, %338, %0 : vector<3x256xi32>
    %340 = arith.extui %339 : vector<3x256xi1> to vector<3x256xi32>
    %341 = arith.sitofp %340 : vector<3x256xi32> to vector<3x256xf32>
    %342 = arith.truncf %341 : vector<3x256xf32> to vector<3x256xbf16>
    %cst_82 = arith.constant dense<0.000000e+00> : vector<3x5xf32>
    %343 = tpu.matmul %342, %9, %cst_82 {dimension_numbers = #tpu.dot_dimension_numbers<[1], [1], [0], [0], [0, 0, 1, 0], [], []>} : vector<3x256xbf16>, vector<5x256xbf16>, vector<3x5xf32> -> vector<3x5xf32>
    %344 = vector.extract_strided_slice %343 {offsets = [0, 4], sizes = [3, 1], strides = [1, 1]} : vector<3x5xf32> to vector<3x1xf32>
    %cst_83 = arith.constant 1.000000e+00 : f32
    %345 = vector.broadcast %cst_83 : f32 to vector<3x1xf32>
    %346 = arith.maximumf %344, %345 : vector<3x1xf32>
    %347 = tpu.reciprocal %346 {approx = true} : vector<3x1xf32> -> vector<3x1xf32>
    %348 = vector.broadcast %347 : vector<3x1xf32> to vector<3x5xf32>
    %349 = arith.mulf %343, %348 : vector<3x5xf32>
    %cst_84 = arith.constant 0.000000e+00 : f32
    %350 = vector.broadcast %cst_84 : f32 to vector<3x1xf32>
    %351 = arith.cmpf ogt, %344, %350 : vector<3x1xf32>
    %352 = vector.shape_cast %351 : vector<3x1xi1> to vector<3x1xi1>
    %353 = vector.broadcast %352 : vector<3x1xi1> to vector<3x5xi1>
    %354 = arith.select %353, %349, %316 : vector<3x5xi1>, vector<3x5xf32>
    %c9_i32 = arith.constant 9 : i32
    %355 = arith.truncf %354 : vector<3x5xf32> to vector<3x5xbf16>
    %cst_85 = arith.constant dense<0.000000e+00> : vector<3x256xf32>
    %356 = tpu.matmul %355, %9, %cst_85 {dimension_numbers = #tpu.dot_dimension_numbers<[1], [0], [0], [1], [0, 0, 1, 1], [], []>} : vector<3x5xbf16>, vector<5x256xbf16>, vector<3x256xf32> -> vector<3x256xf32>
    %357 = arith.extf %355 : vector<3x5xbf16> to vector<3x5xf32>
    %358 = arith.mulf %357, %357 : vector<3x5xf32>
    %cst_86 = arith.constant dense<0.000000e+00> : vector<3xf32>
    %359 = vector.multi_reduction <add>, %358, %cst_86 [1] : vector<3x5xf32> to vector<3xf32>
    %360 = vector.shape_cast %359 : vector<3xf32> to vector<3x1xf32>
    %cst_87 = arith.constant 2.000000e+00 : f32
    %361 = vector.broadcast %cst_87 : f32 to vector<3x256xf32>
    %362 = arith.mulf %361, %356 : vector<3x256xf32>
    %363 = vector.broadcast %360 : vector<3x1xf32> to vector<3x256xf32>
    %364 = arith.subf %363, %362 : vector<3x256xf32>
    %365 = vector.extract_strided_slice %364 {offsets = [0, 0], sizes = [1, 256], strides = [1, 1]} : vector<3x256xf32> to vector<1x256xf32>
    %c0_i32_88 = arith.constant 0 : i32
    %366 = vector.broadcast %c0_i32_88 : i32 to vector<1x256xi32>
    %367 = vector.extract_strided_slice %364 {offsets = [1, 0], sizes = [1, 256], strides = [1, 1]} : vector<3x256xf32> to vector<1x256xf32>
    %368 = arith.cmpf olt, %367, %365 : vector<1x256xf32>
    %c1_i32_89 = arith.constant 1 : i32
    %369 = vector.broadcast %c1_i32_89 : i32 to vector<1x256xi32>
    %370 = arith.select %368, %369, %366 : vector<1x256xi1>, vector<1x256xi32>
    %371 = arith.select %368, %367, %365 : vector<1x256xi1>, vector<1x256xf32>
    %372 = vector.extract_strided_slice %364 {offsets = [2, 0], sizes = [1, 256], strides = [1, 1]} : vector<3x256xf32> to vector<1x256xf32>
    %373 = arith.cmpf olt, %372, %371 : vector<1x256xf32>
    %c2_i32_90 = arith.constant 2 : i32
    %374 = vector.broadcast %c2_i32_90 : i32 to vector<1x256xi32>
    %375 = arith.select %373, %374, %370 : vector<1x256xi1>, vector<1x256xi32>
    %376 = vector.broadcast %375 : vector<1x256xi32> to vector<3x256xi32>
    %377 = arith.cmpi eq, %376, %0 : vector<3x256xi32>
    %378 = arith.extui %377 : vector<3x256xi1> to vector<3x256xi32>
    %379 = arith.sitofp %378 : vector<3x256xi32> to vector<3x256xf32>
    %380 = arith.truncf %379 : vector<3x256xf32> to vector<3x256xbf16>
    %cst_91 = arith.constant dense<0.000000e+00> : vector<3x5xf32>
    %381 = tpu.matmul %380, %9, %cst_91 {dimension_numbers = #tpu.dot_dimension_numbers<[1], [1], [0], [0], [0, 0, 1, 0], [], []>} : vector<3x256xbf16>, vector<5x256xbf16>, vector<3x5xf32> -> vector<3x5xf32>
    %382 = vector.extract_strided_slice %381 {offsets = [0, 4], sizes = [3, 1], strides = [1, 1]} : vector<3x5xf32> to vector<3x1xf32>
    %cst_92 = arith.constant 1.000000e+00 : f32
    %383 = vector.broadcast %cst_92 : f32 to vector<3x1xf32>
    %384 = arith.maximumf %382, %383 : vector<3x1xf32>
    %385 = tpu.reciprocal %384 {approx = true} : vector<3x1xf32> -> vector<3x1xf32>
    %386 = vector.broadcast %385 : vector<3x1xf32> to vector<3x5xf32>
    %387 = arith.mulf %381, %386 : vector<3x5xf32>
    %cst_93 = arith.constant 0.000000e+00 : f32
    %388 = vector.broadcast %cst_93 : f32 to vector<3x1xf32>
    %389 = arith.cmpf ogt, %382, %388 : vector<3x1xf32>
    %390 = vector.shape_cast %389 : vector<3x1xi1> to vector<3x1xi1>
    %391 = vector.broadcast %390 : vector<3x1xi1> to vector<3x5xi1>
    %392 = arith.select %391, %387, %354 : vector<3x5xi1>, vector<3x5xf32>
    %393 = vector.extract_strided_slice %381 {offsets = [0, 4], sizes = [3, 1], strides = [1, 1]} : vector<3x5xf32> to vector<3x1xf32>
    %cst_94 = arith.constant 1.000000e+00 : f32
    %394 = vector.broadcast %cst_94 : f32 to vector<3x1xf32>
    %395 = arith.maximumf %393, %394 : vector<3x1xf32>
    %396 = tpu.reciprocal %395 {approx = true} : vector<3x1xf32> -> vector<3x1xf32>
    %397 = vector.extract_strided_slice %381 {offsets = [0, 0], sizes = [3, 4], strides = [1, 1]} : vector<3x5xf32> to vector<3x4xf32>
    %398 = vector.broadcast %396 : vector<3x1xf32> to vector<3x4xf32>
    %399 = arith.mulf %397, %398 : vector<3x4xf32>
    %cst_95 = arith.constant 0.000000e+00 : f32
    %400 = vector.broadcast %cst_95 : f32 to vector<3x1xf32>
    %401 = arith.cmpf ogt, %393, %400 : vector<3x1xf32>
    %cst_96 = arith.constant 0.000000e+00 : f32
    %402 = vector.broadcast %cst_96 : f32 to vector<3x4xf32>
    %403 = vector.shape_cast %401 : vector<3x1xi1> to vector<3x1xi1>
    %404 = vector.broadcast %403 : vector<3x1xi1> to vector<3x4xi1>
    %405 = arith.select %404, %399, %402 : vector<3x4xi1>, vector<3x4xf32>
    %c0_97 = arith.constant 0 : index
    %c0_98 = arith.constant 0 : index
    %c0_99 = arith.constant 0 : index
    %406 = vector.load %arg2[%c0_97, %c0_98, %c0_99] : memref<1x3x4xf32, #tpu.memory_space<vmem>>, vector<1x3x4xf32>
    %407 = vector.shape_cast %406 : vector<1x3x4xf32> to vector<3x4xf32>
    %408 = vector.shape_cast %405 : vector<3x4xf32> to vector<1x3x4xf32>
    tpu.vector_store %arg2[%c0_97, %c0_98, %c0_99], %408 {strides = array<i32>} : memref<1x3x4xf32, #tpu.memory_space<vmem>>, vector<1x3x4xf32>,
    %c0_100 = arith.constant 0 : index
    %c0_101 = arith.constant 0 : index
    %c0_102 = arith.constant 0 : index
    %409 = vector.load %arg3[%c0_100, %c0_101, %c0_102] : memref<1x1x256xi32, #tpu.memory_space<vmem>>, vector<1x1x256xi32>
    %410 = vector.shape_cast %409 : vector<1x1x256xi32> to vector<1x256xi32>
    %411 = vector.shape_cast %375 : vector<1x256xi32> to vector<1x1x256xi32>
    tpu.vector_store %arg3[%c0_100, %c0_101, %c0_102], %411 {strides = array<i32>} : memref<1x1x256xi32, #tpu.memory_space<vmem>>, vector<1x1x256xi32>,
    return
  }
  func.func @transform_0(%arg0: i32) -> (i32, i32, i32) {
    %c0_i32 = arith.constant 0 : i32
    %c0_i32_0 = arith.constant 0 : i32
    %c0_i32_1 = arith.constant 0 : i32
    return %arg0, %c0_i32, %c0_i32_0 : i32, i32, i32
  }
  func.func @transform_1(%arg0: i32) -> (i32, i32, i32) {
    %c0_i32 = arith.constant 0 : i32
    %c0_i32_0 = arith.constant 0 : i32
    %c0_i32_1 = arith.constant 0 : i32
    return %arg0, %c0_i32, %c0_i32_0 : i32, i32, i32
  }
  func.func @transform_2(%arg0: i32) -> (i32, i32, i32) {
    %c0_i32 = arith.constant 0 : i32
    %c0_i32_0 = arith.constant 0 : i32
    %c0_i32_1 = arith.constant 0 : i32
    return %arg0, %c0_i32, %c0_i32_0 : i32, i32, i32
  }
}

</mosaic_0001>

<bundles_post_ra>
// kernel: tpu_custom_call.1
= control target key start
LH: loop header
LB: loop body
LE: loop exit
PB: predicated region body
PF: predicated region fallthrough
CT: control target
= control target key end

     0   :  { %8 = vsyncpa [#allocation3], 0  ;;  %s2373_s0 = inlined_call_operand.vmem [shape: bf16[2,5,256], index: 0, kind: input, shape index: {}]   ;;  %s2374_s1 = inlined_call_operand.vmem [shape: f32[2,3,4], index: 1, kind: output, shape index: {0}]   ;;  %s2375_s2 = inlined_call_operand.hbm [shape: s32[2,1,256], index: 2, kind: output, shape index: {1}]  }
   0x1   :  { %10 = vsyncpa [#allocation3 + $0x1], 0  ;;  %s2090_s9 = smov 0   ;;  %s2092_s10 = smov 0  }
   0x2   :  { %s2094_s11 = smov 0   ;;  %s2096_s12 = smov 0  }
   0x3 LB: > { %s2111_s13 = sadd.s32 4294967295, %s2067_s12   ;;  %s1846_s14 = sadd.s32 4294967294, %s2067_s12   ;;  %s2067_s12 = sphi %s2096_s12, %s2381_s12   ;;  %s2063_s11 = sphi %s2094_s11, %s2380_s11   ;;  %s2059_s10 = sphi %s2092_s10, %s2379_s10   ;;  %s2055_s9 = sphi %s2090_s9, %s2378_s9  }
   0x4   : > { %s2115_s15 = sadd.s32 1, %s2067_s12   ;;  %s75_s16 = sadd.s32 1, %s2063_s11 }
   0x5   : > { %s72_s17 = ssub.s32 %s2067_s12, %s2115_s15  ;;  %p85_p0 = scmp.ne.s32.totalorder %s2063_s11, %s2059_s10 }
   0x6   : > { %p73_p1 = scmp.eq.s32.totalorder %s72_s17, 0  ;;  %p86_p2 = scmp.eq.s32.totalorder %s2111_s13, 1 }
   0x7   : > { %p91_p3 = scmp.ne.s32.totalorder %s2059_s10, %s2055_s9  ;;  %p92_p4 = scmp.eq.s32.totalorder %s1846_s14, 1 }
   0x8   : > { %s2126_s18 = scalar_select %p73_p1, %s2063_s11, %s75_s16  }
   0x9   : > { %p2128_p5 = por %p86_p2, %p85_p0  ;;  %p2132_p6 = por %p92_p4, %p91_p3 }
   0xa   : > { %p1849_p7 = scmp.ge.s32.totalorder %s2067_s12, 1  ;;  %p118_p8 = scmp.lt.s32.totalorder %s2067_s12, 3 }
   0xc   : > { %p119_p9 = pnand %p1849_p7, %p118_p8 }
   0xd   : > { %p144_p10 = scmp.lt.s32.totalorder (!%p119_p9), %s2111_s13, 1  ;;  %s141_s26 = sand.u32 (!%p119_p9), 1, %s2059_s10  }
   0xe   : > { %122 = sbr.rel (%p119_p9) target bundleno = 5757 (0x167d), region = 24  ;;  %s1850_s27 = sshll.u32 (!%p119_p9), %s141_s26, 1 }
   0xf   : > { %s143_s28 = scalar_lea.vmem (!%p119_p9), [#allocation2], %s1850_s27  ;;  %s1938_s29 = sshll.u32 (!%p119_p9), %s2111_s13, 5 }
  0x10   : > { %s1763_s30 = sshll.u32 (!%p119_p9), %s143_s28, 4  ;;  %s1761_s5 = scalar_lea.hbm (!%p119_p9), %s2375_s2, %s1938_s29  ;;  %s1764_s30 = int_to_ptr.vmem [resolvable:$true] %s1763_s30 }
  0x11   : > { %s1746_s6 = scalar_lea.sflag (!%p119_p9), [#allocation3], %s141_s26  ;;  %s2007_s7 = scalar_lea.vmem (!%p119_p9), %s1764_s30, 32 }
  0x12   : > { %p2008_p11 = scmp.ne.s32.totalorder (!%p119_p9), %s1764_s30, %s2007_s7  ;;  %s2074_s8 = smov (!%p119_p9), [#allocation2]  }
  0x13   : > { %v154_v0 = vlaneseq  ;;  %vm221_vm0 = vcmask 1041408   ;;  %s2140_s21 = scalar_select %p144_p10, %s2111_s13, 1  ;;  %vm222_vm1 = vcmask 1042432   ;;  %v2069_v3 = vmov 65535  }
  0x14   : > { %v223_v4 = vsel %vm221_vm0, 4294967295, %v2069_v3  ;;  %v2070_v11 = vmov 1.0|1.0   ;;  %v2071_v14 = vmov 0   ;;  %vm217_vm6 = vcmask 39936   ;;  %p2009_p12 = pnand %p2008_p11, %p2128_p5  ;;  %s2011_s14 = sshll.u32 %s2074_s8, 4  ;;  %s2012_s14 = int_to_ptr.vmem [resolvable:$false] %s2011_s14 }
  0x15   : > { %v2143_v1 = vshrl.u32 %v154_v0, 7  ;;  %v157_v2 = vand.u32 127, %v154_v0  ;;  %s1937_s22 = sshll.u32 %s2140_s21, 3  ;;  %v224_v8 = vsel %vm222_vm1, %v223_v4, 0  ;;  %263 = vmatprep.mubr.bf16.mxu1 %v2071_v14  ;;  %vm274_vm7 = vcmask 34816   ;;  %s2013_s16 = scalar_lea.vmem %s2012_s14, 64 }
  0x16   : > { %s148_s25 = scalar_lea.vmem %s2373_s0, %s1937_s22  ;;  %v2072_v47 = vmov 4   ;;  %p2010_p13 = pneg %p2009_p12 }
  0x17   : > { %v158_v5 = vadd.s32 128, %v157_v2  ;;  %v159_v6 = vmul.u32 85, %v2143_v1  ;;  %v168_v7 = vld [vmem:[%s148_s25] sm:$0x77]  ;;  %v2183_v37 = vsub.s32 2, %v2143_v1  ;;  %1984 = vset.pattern.permute.xlu1 %v2072_v47  ;;  %1983 = vset.pattern.permute.xlu0 %v2072_v47  ;;  %p2014_p0 = scmp.lt.s32.totalorder %s1764_s30, %s2012_s14  ;;  %p2015_p1 = scmp.lt.s32.totalorder %s2013_s16, %s2007_s7 }
  0x18   : > { %v2151_v9 = vcombine.high %v168_v7, %v168_v7  ;;  %v2153_v10 = vcombine.low %v168_v7, %v168_v7 }
  0x19   : > { %vm161_vm2 = vcmp.eq.s32.totalorder %v158_v5, %v159_v6  ;;  %vm160_vm4 = vcmp.eq.s32.totalorder %v157_v2, %v159_v6  ;;  %p2016_p2 = por %p2015_p1, %p2014_p0 }
  0x1a   : > { %vm1858_vm3 = vmpackc.low %vm161_vm2, %vm161_vm2  ;;  %190 = vmatprep.subr.bf16.mxu0 %v2151_v9  ;;  %v2158_v12 = vand.u32 %v2151_v9, %v224_v8  ;;  %v2165_v13 = vand.u32 %v2153_v10, %v224_v8 }
  0x1b   : > { %1859 = vmatprep.mubr.msk.bf16.mxu0 %vm1858_vm3, %v2070_v11  ;;  %191 = vmatpush1.bf16.xpose.msra.mxu0 %v2153_v10  ;;  %vm1860_vm5 = vmpackc.low %vm160_vm4, %vm160_vm4  ;;  %p2017_p3 = pnand %p2016_p2, %p2010_p13 }
  0x1c   : > { %245 = vmatprep.subr.bf16.mxu1 %v2158_v12  ;;  %395 = vmatprep.subr.bf16.mxu0 %v2158_v12 }
  0x1d   : > { %246 = vmatpush1.bf16.msra.mxu1 %v2165_v13 }
  0x1e   : > { %336 = vmatprep.subr.bf16.mxu1 %v2151_v9 }
  0x22   : > { %1861 = vmatmul.mubr.msk.bf16.vlgmr.msra.gmra.mxu0 %vm1860_vm5, %v2070_v11 }
  0x23   : > { %396 = vmatpush1.bf16.msra.mxu0 %v2165_v13  ;;  %413 = vmatprep.mubr.bf16.mxu0 %v2071_v14 }
  0x24   : > { %544 = vmatprep.subr.bf16.mxu0 %v2158_v12 }
  0xe2   : > { %v2173_v15 = vpop.f32.mrf.mxu0 }
  0xe3   : > { %v216_v16 = vpack.c.bf16 %v2173_v15, %v2173_v15 }
  0xe4   : > { %v212_v17 = vpop.f32.mrf.mxu0 }
  0xe5   : > { %1862 = vmatmul.mubr.msk.bf16.vlgmr.msra.gmra.mxu1 %vm217_vm6, %v216_v16  ;;  %v272_v18 = vunpack.c.l.bf16 %v216_v16 }
  0xe6   : > { %v213_v19 = vpop.f32.mrf.mxu0  ;;  %337 = vmatpush1.bf16.xpose.msra.mxu1 %v2153_v10 }
  0xe7   : > { %v273_v20 = vmul.f32 %v272_v18, %v272_v18  ;;  %485 = vmatprep.subr.bf16.mxu1 %v2151_v9 }
  0xe8   : > { %v214_v21 = vpop.f32.mrf.mxu0 }
  0xe9   : > { %v275_v22 = vsel %vm274_vm7, %v273_v20, 0.0 }
  0xea   : > { %276 = vadd.xlane.f32.xlu0 %v275_v22 }
 0x173   : > { %v277_v25 = vpop.xlane.xlu0 %276 }
 0x1a5   : > { %v265_v23 = vpop.f32.mrf.mxu1 }
 0x1a6   : > { %v278_v24 = vmul.f32 2.0, %v265_v23 }
 0x1a7   : > { %v267_v26 = vpop.f32.mrf.mxu1 }
 0x1a8   : > { %v280_v27 = vsub.f32 %v277_v25, %v278_v24  ;;  %v279_v28 = vmul.f32 2.0, %v267_v26 }
 0x1a9   : > { %v269_v29 = vpop.f32.mrf.mxu1 }
 0x1aa   : > { %v284_v30 = vrot.slane %v280_v27, 7  ;;  %v281_v31 = vsub.f32 %v277_v25, %v279_v28 }
 0x1ab   : > { %v270_v32 = vpop.f32.mrf.mxu1 }
 0x1ac   : > { %vm288_vm8 = vcmp.lt.f32.partialorder %v280_v27, %v284_v30  ;;  %v285_v33 = vrot.slane %v281_v31, 7 }
 0x1ad   : > { %v292_v34 = vsel %vm288_vm8, %v280_v27, %v284_v30  ;;  %v290_v35 = vsel %vm288_vm8, 1, %v2071_v14 }
 0x1ae   : > { %v296_v36 = vrot.slane %v292_v34, 7  ;;  %vm289_vm9 = vcmp.lt.f32.partialorder %v281_v31, %v285_v33  ;;  %v302_v38 = vrot.slane %v290_v35, 7 }
 0x1af   : > { %v291_v39 = vsel %vm289_vm9, 1, %v2071_v14  ;;  %v293_v40 = vsel %vm289_vm9, %v281_v31, %v285_v33 }
 0x1b0   : > { %v297_v41 = vrot.slane %v293_v40, 7  ;;  %v303_v42 = vrot.slane %v291_v39, 7  ;;  %vm300_vm10 = vcmp.lt.f32.partialorder %v280_v27, %v296_v36 }
 0x1b1   : > { %v304_v43 = vsel %vm300_vm10, 2, %v302_v38 }
 0x1b2   : > { %vm301_vm11 = vcmp.lt.f32.partialorder %v281_v31, %v297_v41  ;;  %v309_v44 = vrot.slane %v304_v43, %v2183_v37 }
 0x1b3   : > { %v305_v45 = vsel %vm301_vm11, 2, %v303_v42 }
 0x1b4   : > { %v313_v46 = vrot.slane %v305_v45, %v2183_v37  ;;  %vm314_vm12 = vcmp.eq.s32.totalorder %v309_v44, %v2143_v1 }
 0x1b5   : > { %vm1867_vm15 = vmpackc.low %vm314_vm12, %vm314_vm12 }
 0x1b6   : > { %vm315_vm13 = vcmp.eq.s32.totalorder %v313_v46, %v2143_v1 }
 0x1b7   : > { %vm1865_vm14 = vmpackc.low %vm315_vm13, %vm315_vm13 }
 0x1b8   : > { %1866 = vmatprep.mubr.msk.bf16.mxu1 %vm1865_vm14, %v2070_v11 }
 0x1b9   : > { %1868 = vmatmul.mubr.msk.bf16.vlgmr.msra.gmra.mxu1 %vm1867_vm15, %v2070_v11 }
 0x1ba   : > { %486 = vmatpush1.bf16.xpose.msra.mxu1 %v2153_v10 }
 0x1bb   : > { %634 = vmatprep.subr.bf16.mxu1 %v2151_v9 }
 0x279   : > { %v356_v48 = vpop.f32.mrf.mxu1 }
 0x27a   : > { %v362_v49 = vmax.f32 %v356_v48, 1.0  ;;  %vm370_vm0 = vcmp.gt.f32.partialorder %v356_v48, 0.0 }
 0x27b   : > { %v358_v50 = vpop.f32.mrf.mxu1  ;;  %v371_v51 = vsel %vm370_vm0, 1, %v2071_v14 }
 0x27c   : > { %1987 = vrcp.f32 %v362_v49  ;;  %373 = vperm.xlu1 %1984, %v371_v51  }
 0x27d   : > { %v359_v52 = vpop.f32.mrf.mxu1 }
 0x27f   : > { %v360_v53 = vpop.f32.mrf.mxu1 }
 0x289   : > { %v1988_v54 = vpop.eup %1987 }
 0x28a   : > { %366 = vperm.xlu0 %1983, %v1988_v54  }
 0x2f7   : > { %v374_v55 = vpop.permute.xlu1 %373 }
 0x2f8   : > { %vm375_vm1 = vcmp.eq.s32.totalorder %v374_v55, 1 }
 0x305   : > { %v367_v56 = vpop.permute.xlu0 %366 }
 0x306   : > { %v369_v57 = vmul.f32 %v367_v56, %v356_v48 }
 0x308   : > { %v376_v58 = vsel %vm375_vm1, %v369_v57, %v2173_v15 }
 0x309   : > { %v377_v59 = vpack.c.bf16 %v376_v58, %v376_v58 }
 0x30b   : > { %1869 = vmatmul.mubr.msk.bf16.vlgmr.msra.gmra.mxu0 %vm217_vm6, %v377_v59  ;;  %v422_v60 = vunpack.c.l.bf16 %v377_v59 }
 0x30c   : > { %545 = vmatpush1.bf16.msra.mxu0 %v2165_v13  ;;  %562 = vmatprep.mubr.bf16.mxu0 %v2071_v14 }
 0x30d   : > { %v423_v61 = vmul.f32 %v422_v60, %v422_v60  ;;  %693 = vmatprep.subr.bf16.mxu0 %v2158_v12 }
 0x30f   : > { %v424_v62 = vsel %vm274_vm7, %v423_v61, 0.0 }
 0x310   : > { %425 = vadd.xlane.f32.xlu1 %v424_v62 }
 0x399   : > { %v426_v3 = vpop.xlane.xlu1 %425 }
 0x3cb   : > { %v415_v63 = vpop.f32.mrf.mxu0 }
 0x3cc   : > { %v427_v2 = vmul.f32 2.0, %v415_v63 }
 0x3cd   : > { %v417_v4 = vpop.f32.mrf.mxu0 }
 0x3ce   : > { %v429_v5 = vsub.f32 %v426_v3, %v427_v2  ;;  %v428_v6 = vmul.f32 2.0, %v417_v4 }
 0x3cf   : > { %v419_v7 = vpop.f32.mrf.mxu0 }
 0x3d0   : > { %v433_v8 = vrot.slane %v429_v5, 7  ;;  %v430_v15 = vsub.f32 %v426_v3, %v428_v6 }
 0x3d1   : > { %v420_v16 = vpop.f32.mrf.mxu0 }
 0x3d2   : > { %vm437_vm2 = vcmp.lt.f32.partialorder %v429_v5, %v433_v8  ;;  %v434_v17 = vrot.slane %v430_v15, 7 }
 0x3d3   : > { %v441_v18 = vsel %vm437_vm2, %v429_v5, %v433_v8  ;;  %v439_v19 = vsel %vm437_vm2, 1, %v2071_v14 }
 0x3d4   : > { %v445_v20 = vrot.slane %v441_v18, 7  ;;  %vm438_vm3 = vcmp.lt.f32.partialorder %v430_v15, %v434_v17  ;;  %v451_v21 = vrot.slane %v439_v19, 7 }
 0x3d5   : > { %v440_v22 = vsel %vm438_vm3, 1, %v2071_v14  ;;  %v442_v23 = vsel %vm438_vm3, %v430_v15, %v434_v17 }
 0x3d6   : > { %v446_v24 = vrot.slane %v442_v23, 7  ;;  %v452_v25 = vrot.slane %v440_v22, 7  ;;  %vm449_vm4 = vcmp.lt.f32.partialorder %v429_v5, %v445_v20 }
 0x3d7   : > { %v453_v26 = vsel %vm449_vm4, 2, %v451_v21 }
 0x3d8   : > { %vm450_vm5 = vcmp.lt.f32.partialorder %v430_v15, %v446_v24  ;;  %v458_v27 = vrot.slane %v453_v26, %v2183_v37 }
 0x3d9   : > { %v454_v28 = vsel %vm450_vm5, 2, %v452_v25 }
 0x3da   : > { %v462_v29 = vrot.slane %v454_v28, %v2183_v37  ;;  %vm463_vm8 = vcmp.eq.s32.totalorder %v458_v27, %v2143_v1 }
 0x3db   : > { %vm1874_vm11 = vmpackc.low %vm463_vm8, %vm463_vm8 }
 0x3dc   : > { %vm464_vm9 = vcmp.eq.s32.totalorder %v462_v29, %v2143_v1 }
 0x3dd   : > { %vm1872_vm10 = vmpackc.low %vm464_vm9, %vm464_vm9 }
 0x3de   : > { %1873 = vmatprep.mubr.msk.bf16.mxu1 %vm1872_vm10, %v2070_v11 }
 0x3df   : > { %1875 = vmatmul.mubr.msk.bf16.vlgmr.msra.gmra.mxu1 %vm1874_vm11, %v2070_v11 }
 0x3e0   : > { %635 = vmatpush1.bf16.xpose.msra.mxu1 %v2153_v10 }
 0x3e1   : > { %783 = vmatprep.subr.bf16.mxu1 %v2151_v9 }
 0x49f   : > { %v505_v30 = vpop.f32.mrf.mxu1 }
 0x4a0   : > { %v511_v31 = vmax.f32 %v505_v30, 1.0  ;;  %vm519_vm12 = vcmp.gt.f32.partialorder %v505_v30, 0.0 }
 0x4a1   : > { %v507_v32 = vpop.f32.mrf.mxu1  ;;  %v520_v33 = vsel %vm519_vm12, 1, %v2071_v14 }
 0x4a2   : > { %1989 = vrcp.f32 %v511_v31  ;;  %522 = vperm.xlu0 %1983, %v520_v33  }
 0x4a3   : > { %v508_v34 = vpop.f32.mrf.mxu1 }
 0x4a5   : > { %v509_v35 = vpop.f32.mrf.mxu1 }
 0x4af   : > { %v1990_v36 = vpop.eup %1989 }
 0x4b0   : > { %515 = vperm.xlu1 %1984, %v1990_v36  }
 0x51d   : > { %v523_v38 = vpop.permute.xlu0 %522 }
 0x51e   : > { %vm524_vm13 = vcmp.eq.s32.totalorder %v523_v38, 1 }
 0x52b   : > { %v516_v39 = vpop.permute.xlu1 %515 }
 0x52c   : > { %v518_v40 = vmul.f32 %v516_v39, %v505_v30 }
 0x52e   : > { %v525_v41 = vsel %vm524_vm13, %v518_v40, %v376_v58 }
 0x52f   : > { %v526_v42 = vpack.c.bf16 %v525_v41, %v525_v41 }
 0x531   : > { %1876 = vmatmul.mubr.msk.bf16.vlgmr.msra.gmra.mxu0 %vm217_vm6, %v526_v42  ;;  %v571_v43 = vunpack.c.l.bf16 %v526_v42 }
 0x532   : > { %694 = vmatpush1.bf16.msra.mxu0 %v2165_v13  ;;  %711 = vmatprep.mubr.bf16.mxu0 %v2071_v14 }
 0x533   : > { %v572_v44 = vmul.f32 %v571_v43, %v571_v43  ;;  %842 = vmatprep.subr.bf16.mxu0 %v2158_v12 }
 0x535   : > { %v573_v45 = vsel %vm274_vm7, %v572_v44, 0.0 }
 0x536   : > { %574 = vadd.xlane.f32.xlu0 %v573_v45 }
 0x5bf   : > { %v575_v48 = vpop.xlane.xlu0 %574 }
 0x5f1   : > { %v564_v46 = vpop.f32.mrf.mxu0 }
 0x5f2   : > { %v576_v47 = vmul.f32 2.0, %v564_v46 }
 0x5f3   : > { %v566_v49 = vpop.f32.mrf.mxu0 }
 0x5f4   : > { %v578_v50 = vsub.f32 %v575_v48, %v576_v47  ;;  %v577_v51 = vmul.f32 2.0, %v566_v49 }
 0x5f5   : > { %v568_v52 = vpop.f32.mrf.mxu0 }
 0x5f6   : > { %v582_v53 = vrot.slane %v578_v50, 7  ;;  %v579_v54 = vsub.f32 %v575_v48, %v577_v51 }
 0x5f7   : > { %v569_v55 = vpop.f32.mrf.mxu0 }
 0x5f8   : > { %vm586_vm14 = vcmp.lt.f32.partialorder %v578_v50, %v582_v53  ;;  %v583_v56 = vrot.slane %v579_v54, 7 }
 0x5f9   : > { %v590_v57 = vsel %vm586_vm14, %v578_v50, %v582_v53  ;;  %v588_v58 = vsel %vm586_vm14, 1, %v2071_v14 }
 0x5fa   : > { %v594_v59 = vrot.slane %v590_v57, 7  ;;  %vm587_vm15 = vcmp.lt.f32.partialorder %v579_v54, %v583_v56  ;;  %v600_v60 = vrot.slane %v588_v58, 7 }
 0x5fb   : > { %v589_v61 = vsel %vm587_vm15, 1, %v2071_v14  ;;  %v591_v62 = vsel %vm587_vm15, %v579_v54, %v583_v56 }
 0x5fc   : > { %v595_v63 = vrot.slane %v591_v62, 7  ;;  %v601_v2 = vrot.slane %v589_v61, 7  ;;  %vm598_vm0 = vcmp.lt.f32.partialorder %v578_v50, %v594_v59 }
 0x5fd   : > { %v602_v3 = vsel %vm598_vm0, 2, %v600_v60 }
 0x5fe   : > { %vm599_vm1 = vcmp.lt.f32.partialorder %v579_v54, %v595_v63  ;;  %v607_v4 = vrot.slane %v602_v3, %v2183_v37 }
 0x5ff   : > { %v603_v5 = vsel %vm599_vm1, 2, %v601_v2 }
 0x600   : > { %v611_v6 = vrot.slane %v603_v5, %v2183_v37  ;;  %vm612_vm2 = vcmp.eq.s32.totalorder %v607_v4, %v2143_v1 }
 0x601   : > { %vm1881_vm5 = vmpackc.low %vm612_vm2, %vm612_vm2 }
 0x602   : > { %vm613_vm3 = vcmp.eq.s32.totalorder %v611_v6, %v2143_v1 }
 0x603   : > { %vm1879_vm4 = vmpackc.low %vm613_vm3, %vm613_vm3 }
 0x604   : > { %1880 = vmatprep.mubr.msk.bf16.mxu1 %vm1879_vm4, %v2070_v11 }
 0x605   : > { %1882 = vmatmul.mubr.msk.bf16.vlgmr.msra.gmra.mxu1 %vm1881_vm5, %v2070_v11 }
 0x606   : > { %784 = vmatpush1.bf16.xpose.msra.mxu1 %v2153_v10 }
 0x607   : > { %932 = vmatprep.subr.bf16.mxu1 %v2151_v9 }
 0x6c5   : > { %v654_v7 = vpop.f32.mrf.mxu1 }
 0x6c6   : > { %v660_v8 = vmax.f32 %v654_v7, 1.0  ;;  %vm668_vm8 = vcmp.gt.f32.partialorder %v654_v7, 0.0 }
 0x6c7   : > { %v656_v15 = vpop.f32.mrf.mxu1  ;;  %v669_v19 = vsel %vm668_vm8, 1, %v2071_v14 }
 0x6c8   : > { %1991 = vrcp.f32 %v660_v8 }
 0x6c9   : > { %v657_v16 = vpop.f32.mrf.mxu1 }
 0x6cb   : > { %v658_v17 = vpop.f32.mrf.mxu1 }
 0x6d5   : > { %v1992_v18 = vpop.eup %1991 }
 0x6d6   : > { %664 = vperm.xlu1 %1984, %v1992_v18  }
 0x6da   : > { %671 = vperm.xlu1 %1984, %v669_v19  }
 0x751   : > { %v665_v20 = vpop.permute.xlu1 %664 }
 0x752   : > { %v667_v21 = vmul.f32 %v665_v20, %v654_v7 }
 0x755   : > { %v672_v22 = vpop.permute.xlu1 %671 }
 0x756   : > { %vm673_vm9 = vcmp.eq.s32.totalorder %v672_v22, 1 }
 0x757   : > { %v674_v23 = vsel %vm673_vm9, %v667_v21, %v525_v41 }
 0x758   : > { %v675_v24 = vpack.c.bf16 %v674_v23, %v674_v23 }
 0x75a   : > { %1883 = vmatmul.mubr.msk.bf16.vlgmr.msra.gmra.mxu0 %vm217_vm6, %v675_v24  ;;  %v720_v25 = vunpack.c.l.bf16 %v675_v24 }
 0x75b   : > { %843 = vmatpush1.bf16.msra.mxu0 %v2165_v13  ;;  %860 = vmatprep.mubr.bf16.mxu0 %v2071_v14 }
 0x75c   : > { %v721_v26 = vmul.f32 %v720_v25, %v720_v25  ;;  %991 = vmatprep.subr.bf16.mxu0 %v2158_v12 }
 0x75e   : > { %v722_v27 = vsel %vm274_vm7, %v721_v26, 0.0 }
 0x75f   : > { %723 = vadd.xlane.f32.xlu1 %v722_v27 }
 0x7e8   : > { %v724_v30 = vpop.xlane.xlu1 %723 }
 0x81a   : > { %v713_v28 = vpop.f32.mrf.mxu0 }
 0x81b   : > { %v725_v29 = vmul.f32 2.0, %v713_v28 }
 0x81c   : > { %v715_v31 = vpop.f32.mrf.mxu0 }
 0x81d   : > { %v727_v32 = vsub.f32 %v724_v30, %v725_v29  ;;  %v726_v33 = vmul.f32 2.0, %v715_v31 }
 0x81e   : > { %v717_v34 = vpop.f32.mrf.mxu0 }
 0x81f   : > { %v731_v35 = vrot.slane %v727_v32, 7  ;;  %v728_v36 = vsub.f32 %v724_v30, %v726_v33 }
 0x820   : > { %v718_v38 = vpop.f32.mrf.mxu0 }
 0x821   : > { %vm735_vm10 = vcmp.lt.f32.partialorder %v727_v32, %v731_v35  ;;  %v732_v39 = vrot.slane %v728_v36, 7 }
 0x822   : > { %v739_v40 = vsel %vm735_vm10, %v727_v32, %v731_v35  ;;  %v737_v41 = vsel %vm735_vm10, 1, %v2071_v14 }
 0x823   : > { %v743_v42 = vrot.slane %v739_v40, 7  ;;  %vm736_vm11 = vcmp.lt.f32.partialorder %v728_v36, %v732_v39  ;;  %v749_v43 = vrot.slane %v737_v41, 7 }
 0x824   : > { %v738_v44 = vsel %vm736_vm11, 1, %v2071_v14  ;;  %v740_v45 = vsel %vm736_vm11, %v728_v36, %v732_v39 }
 0x825   : > { %v744_v46 = vrot.slane %v740_v45, 7  ;;  %v750_v47 = vrot.slane %v738_v44, 7  ;;  %vm747_vm12 = vcmp.lt.f32.partialorder %v727_v32, %v743_v42 }
 0x826   : > { %v751_v48 = vsel %vm747_vm12, 2, %v749_v43 }
 0x827   : > { %vm748_vm13 = vcmp.lt.f32.partialorder %v728_v36, %v744_v46  ;;  %v756_v49 = vrot.slane %v751_v48, %v2183_v37 }
 0x828   : > { %v752_v50 = vsel %vm748_vm13, 2, %v750_v47 }
 0x829   : > { %v760_v51 = vrot.slane %v752_v50, %v2183_v37  ;;  %vm761_vm14 = vcmp.eq.s32.totalorder %v756_v49, %v2143_v1 }
 0x82a   : > { %vm1888_vm1 = vmpackc.low %vm761_vm14, %vm761_vm14 }
 0x82b   : > { %vm762_vm15 = vcmp.eq.s32.totalorder %v760_v51, %v2143_v1 }
 0x82c   : > { %vm1886_vm0 = vmpackc.low %vm762_vm15, %vm762_vm15 }
 0x82d   : > { %1887 = vmatprep.mubr.msk.bf16.mxu1 %vm1886_vm0, %v2070_v11 }
 0x82e   : > { %1889 = vmatmul.mubr.msk.bf16.vlgmr.msra.gmra.mxu1 %vm1888_vm1, %v2070_v11 }
 0x82f   : > { %933 = vmatpush1.bf16.xpose.msra.mxu1 %v2153_v10 }
 0x830   : > { %1081 = vmatprep.subr.bf16.mxu1 %v2151_v9 }
 0x8ee   : > { %v803_v52 = vpop.f32.mrf.mxu1 }
 0x8ef   : > { %v809_v53 = vmax.f32 %v803_v52, 1.0  ;;  %vm817_vm2 = vcmp.gt.f32.partialorder %v803_v52, 0.0 }
 0x8f0   : > { %v805_v54 = vpop.f32.mrf.mxu1  ;;  %v818_v55 = vsel %vm817_vm2, 1, %v2071_v14 }
 0x8f1   : > { %1993 = vrcp.f32 %v809_v53  ;;  %820 = vperm.xlu1 %1984, %v818_v55  }
 0x8f2   : > { %v806_v56 = vpop.f32.mrf.mxu1 }
 0x8f4   : > { %v807_v57 = vpop.f32.mrf.mxu1 }
 0x8fe   : > { %v1994_v58 = vpop.eup %1993 }
 0x8ff   : > { %813 = vperm.xlu0 %1983, %v1994_v58  }
 0x96c   : > { %v821_v59 = vpop.permute.xlu1 %820 }
 0x96d   : > { %vm822_vm3 = vcmp.eq.s32.totalorder %v821_v59, 1 }
 0x97a   : > { %v814_v60 = vpop.permute.xlu0 %813 }
 0x97b   : > { %v816_v61 = vmul.f32 %v814_v60, %v803_v52 }
 0x97d   : > { %v823_v62 = vsel %vm822_vm3, %v816_v61, %v674_v23 }
 0x97e   : > { %v824_v63 = vpack.c.bf16 %v823_v62, %v823_v62 }
 0x980   : > { %1890 = vmatmul.mubr.msk.bf16.vlgmr.msra.gmra.mxu0 %vm217_vm6, %v824_v63  ;;  %v869_v2 = vunpack.c.l.bf16 %v824_v63 }
 0x981   : > { %992 = vmatpush1.bf16.msra.mxu0 %v2165_v13  ;;  %1009 = vmatprep.mubr.bf16.mxu0 %v2071_v14 }
 0x982   : > { %v870_v3 = vmul.f32 %v869_v2, %v869_v2  ;;  %1140 = vmatprep.subr.bf16.mxu0 %v2158_v12 }
 0x984   : > { %v871_v4 = vsel %vm274_vm7, %v870_v3, 0.0 }
 0x985   : > { %872 = vadd.xlane.f32.xlu0 %v871_v4 }
 0xa0e   : > { %v873_v7 = vpop.xlane.xlu0 %872 }
 0xa40   : > { %v862_v5 = vpop.f32.mrf.mxu0 }
 0xa41   : > { %v874_v6 = vmul.f32 2.0, %v862_v5 }
 0xa42   : > { %v864_v8 = vpop.f32.mrf.mxu0 }
 0xa43   : > { %v876_v15 = vsub.f32 %v873_v7, %v874_v6  ;;  %v875_v16 = vmul.f32 2.0, %v864_v8 }
 0xa44   : > { %v866_v17 = vpop.f32.mrf.mxu0 }
 0xa45   : > { %v880_v18 = vrot.slane %v876_v15, 7  ;;  %v877_v19 = vsub.f32 %v873_v7, %v875_v16 }
 0xa46   : > { %v867_v20 = vpop.f32.mrf.mxu0 }
 0xa47   : > { %vm884_vm4 = vcmp.lt.f32.partialorder %v876_v15, %v880_v18  ;;  %v881_v21 = vrot.slane %v877_v19, 7 }
 0xa48   : > { %v888_v22 = vsel %vm884_vm4, %v876_v15, %v880_v18  ;;  %v886_v23 = vsel %vm884_vm4, 1, %v2071_v14 }
 0xa49   : > { %v892_v24 = vrot.slane %v888_v22, 7  ;;  %vm885_vm5 = vcmp.lt.f32.partialorder %v877_v19, %v881_v21  ;;  %v898_v25 = vrot.slane %v886_v23, 7 }
 0xa4a   : > { %v887_v26 = vsel %vm885_vm5, 1, %v2071_v14  ;;  %v889_v27 = vsel %vm885_vm5, %v877_v19, %v881_v21 }
 0xa4b   : > { %v893_v28 = vrot.slane %v889_v27, 7  ;;  %v899_v29 = vrot.slane %v887_v26, 7  ;;  %vm896_vm8 = vcmp.lt.f32.partialorder %v876_v15, %v892_v24 }
 0xa4c   : > { %v900_v30 = vsel %vm896_vm8, 2, %v898_v25 }
 0xa4d   : > { %vm897_vm9 = vcmp.lt.f32.partialorder %v877_v19, %v893_v28  ;;  %v905_v31 = vrot.slane %v900_v30, %v2183_v37 }
 0xa4e   : > { %v901_v32 = vsel %vm897_vm9, 2, %v899_v29 }
 0xa4f   : > { %v909_v33 = vrot.slane %v901_v32, %v2183_v37  ;;  %vm910_vm10 = vcmp.eq.s32.totalorder %v905_v31, %v2143_v1 }
 0xa50   : > { %vm1895_vm13 = vmpackc.low %vm910_vm10, %vm910_vm10 }
 0xa51   : > { %vm911_vm11 = vcmp.eq.s32.totalorder %v909_v33, %v2143_v1 }
 0xa52   : > { %vm1893_vm12 = vmpackc.low %vm911_vm11, %vm911_vm11 }
 0xa53   : > { %1894 = vmatprep.mubr.msk.bf16.mxu1 %vm1893_vm12, %v2070_v11 }
 0xa54   : > { %1896 = vmatmul.mubr.msk.bf16.vlgmr.msra.gmra.mxu1 %vm1895_vm13, %v2070_v11 }
 0xa55   : > { %1082 = vmatpush1.bf16.xpose.msra.mxu1 %v2153_v10 }
 0xa56   : > { %1230 = vmatprep.subr.bf16.mxu1 %v2151_v9 }
 0xb14   : > { %v952_v34 = vpop.f32.mrf.mxu1 }
 0xb15   : > { %v958_v35 = vmax.f32 %v952_v34, 1.0  ;;  %vm966_vm14 = vcmp.gt.f32.partialorder %v952_v34, 0.0 }
 0xb16   : > { %v954_v36 = vpop.f32.mrf.mxu1  ;;  %v967_v41 = vsel %vm966_vm14, 1, %v2071_v14 }
 0xb17   : > { %1995 = vrcp.f32 %v958_v35 }
 0xb18   : > { %v955_v38 = vpop.f32.mrf.mxu1 }
 0xb1a   : > { %v956_v39 = vpop.f32.mrf.mxu1 }
 0xb24   : > { %v1996_v40 = vpop.eup %1995 }
 0xb25   : > { %962 = vperm.xlu1 %1984, %v1996_v40  }
 0xb29   : > { %969 = vperm.xlu1 %1984, %v967_v41  }
 0xba0   : > { %v963_v42 = vpop.permute.xlu1 %962 }
 0xba1   : > { %v965_v43 = vmul.f32 %v963_v42, %v952_v34 }
 0xba4   : > { %v970_v44 = vpop.permute.xlu1 %969 }
 0xba5   : > { %vm971_vm15 = vcmp.eq.s32.totalorder %v970_v44, 1 }
 0xba6   : > { %v972_v45 = vsel %vm971_vm15, %v965_v43, %v823_v62 }
 0xba7   : > { %v973_v46 = vpack.c.bf16 %v972_v45, %v972_v45 }
 0xba9   : > { %1897 = vmatmul.mubr.msk.bf16.vlgmr.msra.gmra.mxu0 %vm217_vm6, %v973_v46  ;;  %v1018_v47 = vunpack.c.l.bf16 %v973_v46 }
 0xbaa   : > { %1141 = vmatpush1.bf16.msra.mxu0 %v2165_v13  ;;  %1158 = vmatprep.mubr.bf16.mxu0 %v2071_v14 }
 0xbab   : > { %v1019_v48 = vmul.f32 %v1018_v47, %v1018_v47  ;;  %1289 = vmatprep.subr.bf16.mxu0 %v2158_v12 }
 0xbad   : > { %v1020_v49 = vsel %vm274_vm7, %v1019_v48, 0.0 }
 0xbae   : > { %1021 = vadd.xlane.f32.xlu1 %v1020_v49 }
 0xc37   : > { %v1022_v52 = vpop.xlane.xlu1 %1021 }
 0xc69   : > { %v1011_v50 = vpop.f32.mrf.mxu0 }
 0xc6a   : > { %v1023_v51 = vmul.f32 2.0, %v1011_v50 }
 0xc6b   : > { %v1013_v53 = vpop.f32.mrf.mxu0 }
 0xc6c   : > { %v1025_v54 = vsub.f32 %v1022_v52, %v1023_v51  ;;  %v1024_v55 = vmul.f32 2.0, %v1013_v53 }
 0xc6d   : > { %v1015_v56 = vpop.f32.mrf.mxu0 }
 0xc6e   : > { %v1029_v57 = vrot.slane %v1025_v54, 7  ;;  %v1026_v58 = vsub.f32 %v1022_v52, %v1024_v55 }
 0xc6f   : > { %v1016_v59 = vpop.f32.mrf.mxu0 }
 0xc70   : > { %vm1033_vm0 = vcmp.lt.f32.partialorder %v1025_v54, %v1029_v57  ;;  %v1030_v60 = vrot.slane %v1026_v58, 7 }
 0xc71   : > { %v1037_v61 = vsel %vm1033_vm0, %v1025_v54, %v1029_v57  ;;  %v1035_v62 = vsel %vm1033_vm0, 1, %v2071_v14 }
 0xc72   : > { %v1041_v63 = vrot.slane %v1037_v61, 7  ;;  %vm1034_vm1 = vcmp.lt.f32.partialorder %v1026_v58, %v1030_v60  ;;  %v1047_v2 = vrot.slane %v1035_v62, 7 }
 0xc73   : > { %v1036_v3 = vsel %vm1034_vm1, 1, %v2071_v14  ;;  %v1038_v4 = vsel %vm1034_vm1, %v1026_v58, %v1030_v60 }
 0xc74   : > { %v1042_v5 = vrot.slane %v1038_v4, 7  ;;  %v1048_v6 = vrot.slane %v1036_v3, 7  ;;  %vm1045_vm2 = vcmp.lt.f32.partialorder %v1025_v54, %v1041_v63 }
 0xc75   : > { %v1049_v7 = vsel %vm1045_vm2, 2, %v1047_v2 }
 0xc76   : > { %vm1046_vm3 = vcmp.lt.f32.partialorder %v1026_v58, %v1042_v5  ;;  %v1054_v8 = vrot.slane %v1049_v7, %v2183_v37 }
 0xc77   : > { %v1050_v15 = vsel %vm1046_vm3, 2, %v1048_v6 }
 0xc78   : > { %v1058_v16 = vrot.slane %v1050_v15, %v2183_v37  ;;  %vm1059_vm4 = vcmp.eq.s32.totalorder %v1054_v8, %v2143_v1 }
 0xc79   : > { %vm1902_vm9 = vmpackc.low %vm1059_vm4, %vm1059_vm4 }
 0xc7a   : > { %vm1060_vm5 = vcmp.eq.s32.totalorder %v1058_v16, %v2143_v1 }
 0xc7b   : > { %vm1900_vm8 = vmpackc.low %vm1060_vm5, %vm1060_vm5 }
 0xc7c   : > { %1901 = vmatprep.mubr.msk.bf16.mxu1 %vm1900_vm8, %v2070_v11 }
 0xc7d   : > { %1903 = vmatmul.mubr.msk.bf16.vlgmr.msra.gmra.mxu1 %vm1902_vm9, %v2070_v11 }
 0xc7e   : > { %1231 = vmatpush1.bf16.xpose.msra.mxu1 %v2153_v10 }
 0xc7f   : > { %1379 = vmatprep.subr.bf16.mxu1 %v2151_v9 }
 0xd3d   : > { %v1101_v17 = vpop.f32.mrf.mxu1 }
 0xd3e   : > { %v1107_v18 = vmax.f32 %v1101_v17, 1.0  ;;  %vm1115_vm10 = vcmp.gt.f32.partialorder %v1101_v17, 0.0 }
 0xd3f   : > { %v1103_v19 = vpop.f32.mrf.mxu1  ;;  %v1116_v23 = vsel %vm1115_vm10, 1, %v2071_v14 }
 0xd40   : > { %1997 = vrcp.f32 %v1107_v18 }
 0xd41   : > { %v1104_v20 = vpop.f32.mrf.mxu1 }
 0xd43   : > { %v1105_v21 = vpop.f32.mrf.mxu1 }
 0xd4d   : > { %v1998_v22 = vpop.eup %1997 }
 0xd4e   : > { %1111 = vperm.xlu0 %1983, %v1998_v22  }
 0xd52   : > { %1118 = vperm.xlu0 %1983, %v1116_v23  }
 0xdc9   : > { %v1112_v24 = vpop.permute.xlu0 %1111 }
 0xdca   : > { %v1114_v25 = vmul.f32 %v1112_v24, %v1101_v17 }
 0xdcd   : > { %v1119_v26 = vpop.permute.xlu0 %1118 }
 0xdce   : > { %vm1120_vm11 = vcmp.eq.s32.totalorder %v1119_v26, 1 }
 0xdcf   : > { %v1121_v27 = vsel %vm1120_vm11, %v1114_v25, %v972_v45 }
 0xdd0   : > { %v1122_v28 = vpack.c.bf16 %v1121_v27, %v1121_v27 }
 0xdd2   : > { %1904 = vmatmul.mubr.msk.bf16.vlgmr.msra.gmra.mxu0 %vm217_vm6, %v1122_v28  ;;  %v1167_v29 = vunpack.c.l.bf16 %v1122_v28 }
 0xdd3   : > { %1290 = vmatpush1.bf16.msra.mxu0 %v2165_v13  ;;  %1307 = vmatprep.mubr.bf16.mxu0 %v2071_v14 }
 0xdd4   : > { %v1168_v30 = vmul.f32 %v1167_v29, %v1167_v29  ;;  %1438 = vmatprep.subr.bf16.mxu0 %v2158_v12 }
 0xdd6   : > { %v1169_v31 = vsel %vm274_vm7, %v1168_v30, 0.0 }
 0xdd7   : > { %1170 = vadd.xlane.f32.xlu0 %v1169_v31 }
 0xe60   : > { %v1171_v34 = vpop.xlane.xlu0 %1170 }
 0xe92   : > { %v1160_v32 = vpop.f32.mrf.mxu0 }
 0xe93   : > { %v1172_v33 = vmul.f32 2.0, %v1160_v32 }
 0xe94   : > { %v1162_v35 = vpop.f32.mrf.mxu0 }
 0xe95   : > { %v1174_v36 = vsub.f32 %v1171_v34, %v1172_v33  ;;  %v1173_v38 = vmul.f32 2.0, %v1162_v35 }
 0xe96   : > { %v1164_v39 = vpop.f32.mrf.mxu0 }
 0xe97   : > { %v1178_v40 = vrot.slane %v1174_v36, 7  ;;  %v1175_v41 = vsub.f32 %v1171_v34, %v1173_v38 }
 0xe98   : > { %v1165_v42 = vpop.f32.mrf.mxu0 }
 0xe99   : > { %vm1182_vm12 = vcmp.lt.f32.partialorder %v1174_v36, %v1178_v40  ;;  %v1179_v43 = vrot.slane %v1175_v41, 7 }
 0xe9a   : > { %v1186_v44 = vsel %vm1182_vm12, %v1174_v36, %v1178_v40  ;;  %v1184_v45 = vsel %vm1182_vm12, 1, %v2071_v14 }
 0xe9b   : > { %v1190_v46 = vrot.slane %v1186_v44, 7  ;;  %vm1183_vm13 = vcmp.lt.f32.partialorder %v1175_v41, %v1179_v43  ;;  %v1196_v47 = vrot.slane %v1184_v45, 7 }
 0xe9c   : > { %v1185_v48 = vsel %vm1183_vm13, 1, %v2071_v14  ;;  %v1187_v49 = vsel %vm1183_vm13, %v1175_v41, %v1179_v43 }
 0xe9d   : > { %v1191_v50 = vrot.slane %v1187_v49, 7  ;;  %v1197_v51 = vrot.slane %v1185_v48, 7  ;;  %vm1194_vm14 = vcmp.lt.f32.partialorder %v1174_v36, %v1190_v46 }
 0xe9e   : > { %v1198_v52 = vsel %vm1194_vm14, 2, %v1196_v47 }
 0xe9f   : > { %vm1195_vm15 = vcmp.lt.f32.partialorder %v1175_v41, %v1191_v50  ;;  %v1203_v53 = vrot.slane %v1198_v52, %v2183_v37 }
 0xea0   : > { %v1199_v54 = vsel %vm1195_vm15, 2, %v1197_v51 }
 0xea1   : > { %v1207_v55 = vrot.slane %v1199_v54, %v2183_v37  ;;  %vm1208_vm0 = vcmp.eq.s32.totalorder %v1203_v53, %v2143_v1 }
 0xea2   : > { %vm1909_vm3 = vmpackc.low %vm1208_vm0, %vm1208_vm0 }
 0xea3   : > { %vm1209_vm1 = vcmp.eq.s32.totalorder %v1207_v55, %v2143_v1 }
 0xea4   : > { %vm1907_vm2 = vmpackc.low %vm1209_vm1, %vm1209_vm1 }
 0xea5   : > { %1908 = vmatprep.mubr.msk.bf16.mxu1 %vm1907_vm2, %v2070_v11 }
 0xea6   : > { %1910 = vmatmul.mubr.msk.bf16.vlgmr.msra.gmra.mxu1 %vm1909_vm3, %v2070_v11 }
 0xea7   : > { %1380 = vmatpush1.bf16.xpose.msra.mxu1 %v2153_v10 }
 0xea8   : > { %1528 = vmatprep.subr.bf16.mxu1 %v2151_v9 }
 0xf66   : > { %v1250_v56 = vpop.f32.mrf.mxu1 }
 0xf67   : > { %v1256_v57 = vmax.f32 %v1250_v56, 1.0  ;;  %vm1264_vm4 = vcmp.gt.f32.partialorder %v1250_v56, 0.0 }
 0xf68   : > { %v1252_v58 = vpop.f32.mrf.mxu1  ;;  %v1265_v62 = vsel %vm1264_vm4, 1, %v2071_v14 }
 0xf69   : > { %1999 = vrcp.f32 %v1256_v57 }
 0xf6a   : > { %v1253_v59 = vpop.f32.mrf.mxu1 }
 0xf6c   : > { %v1254_v60 = vpop.f32.mrf.mxu1 }
 0xf76   : > { %v2000_v61 = vpop.eup %1999 }
 0xf77   : > { %1260 = vperm.xlu1 %1984, %v2000_v61  }
 0xf7b   : > { %1267 = vperm.xlu1 %1984, %v1265_v62  }
 0xff2   : > { %v1261_v63 = vpop.permute.xlu1 %1260 }
 0xff3   : > { %v1263_v2 = vmul.f32 %v1261_v63, %v1250_v56 }
 0xff6   : > { %v1268_v3 = vpop.permute.xlu1 %1267 }
 0xff7   : > { %vm1269_vm5 = vcmp.eq.s32.totalorder %v1268_v3, 1 }
 0xff8   : > { %v1270_v4 = vsel %vm1269_vm5, %v1263_v2, %v1121_v27 }
 0xff9   : > { %v1271_v5 = vpack.c.bf16 %v1270_v4, %v1270_v4 }
 0xffb   : > { %1911 = vmatmul.mubr.msk.bf16.vlgmr.msra.gmra.mxu0 %vm217_vm6, %v1271_v5  ;;  %v1316_v6 = vunpack.c.l.bf16 %v1271_v5 }
 0xffc   : > { %1439 = vmatpush1.bf16.msra.mxu0 %v2165_v13  ;;  %1456 = vmatprep.mubr.bf16.mxu0 %v2071_v14 }
 0xffd   : > { %v1317_v7 = vmul.f32 %v1316_v6, %v1316_v6  ;;  %1587 = vmatprep.subr.bf16.mxu0 %v2158_v12 }
 0xfff   : > { %v1318_v8 = vsel %vm274_vm7, %v1317_v7, 0.0 }
0x1000   : > { %1319 = vadd.xlane.f32.xlu1 %v1318_v8 }
0x1089   : > { %v1320_v17 = vpop.xlane.xlu1 %1319 }
0x10bb   : > { %v1309_v15 = vpop.f32.mrf.mxu0 }
0x10bc   : > { %v1321_v16 = vmul.f32 2.0, %v1309_v15 }
0x10bd   : > { %v1311_v18 = vpop.f32.mrf.mxu0 }
0x10be   : > { %v1323_v19 = vsub.f32 %v1320_v17, %v1321_v16  ;;  %v1322_v20 = vmul.f32 2.0, %v1311_v18 }
0x10bf   : > { %v1313_v21 = vpop.f32.mrf.mxu0 }
0x10c0   : > { %v1327_v22 = vrot.slane %v1323_v19, 7  ;;  %v1324_v23 = vsub.f32 %v1320_v17, %v1322_v20 }
0x10c1   : > { %v1314_v24 = vpop.f32.mrf.mxu0 }
0x10c2   : > { %vm1331_vm8 = vcmp.lt.f32.partialorder %v1323_v19, %v1327_v22  ;;  %v1328_v25 = vrot.slane %v1324_v23, 7 }
0x10c3   : > { %v1335_v26 = vsel %vm1331_vm8, %v1323_v19, %v1327_v22  ;;  %v1333_v27 = vsel %vm1331_vm8, 1, %v2071_v14 }
0x10c4   : > { %v1339_v28 = vrot.slane %v1335_v26, 7  ;;  %vm1332_vm9 = vcmp.lt.f32.partialorder %v1324_v23, %v1328_v25  ;;  %v1345_v12 = vrot.slane %v1333_v27, 7 }
0x10c5   : > { %v1334_v29 = vsel %vm1332_vm9, 1, %v2071_v14  ;;  %v1336_v30 = vsel %vm1332_vm9, %v1324_v23, %v1328_v25 }
0x10c6   : > { %v1340_v31 = vrot.slane %v1336_v30, 7  ;;  %v1346_v32 = vrot.slane %v1334_v29, 7  ;;  %vm1343_vm10 = vcmp.lt.f32.partialorder %v1323_v19, %v1339_v28 }
0x10c7   : > { %v1347_v33 = vsel %vm1343_vm10, 2, %v1345_v12 }
0x10c8   : > { %vm1344_vm11 = vcmp.lt.f32.partialorder %v1324_v23, %v1340_v31  ;;  %v1352_v34 = vrot.slane %v1347_v33, %v2183_v37 }
0x10c9   : > { %v1348_v35 = vsel %vm1344_vm11, 2, %v1346_v32 }
0x10ca   : > { %v1356_v36 = vrot.slane %v1348_v35, %v2183_v37  ;;  %vm1357_vm12 = vcmp.eq.s32.totalorder %v1352_v34, %v2143_v1 }
0x10cb   : > { %vm1916_vm15 = vmpackc.low %vm1357_vm12, %vm1357_vm12 }
0x10cc   : > { %vm1358_vm13 = vcmp.eq.s32.totalorder %v1356_v36, %v2143_v1 }
0x10cd   : > { %vm1914_vm14 = vmpackc.low %vm1358_vm13, %vm1358_vm13 }
0x10ce   : > { %1915 = vmatprep.mubr.msk.bf16.mxu1 %vm1914_vm14, %v2070_v11 }
0x10cf   : > { %1917 = vmatmul.mubr.msk.bf16.vlgmr.msra.gmra.mxu1 %vm1916_vm15, %v2070_v11 }
0x10d0   : > { %1529 = vmatpush1.bf16.xpose.msra.mxu1 %v2153_v10 }
0x10d1   : > { %1677 = vmatprep.subr.bf16.mxu1 %v2151_v9 }
0x118f   : > { %v1399_v38 = vpop.f32.mrf.mxu1 }
0x1190   : > { %v1405_v39 = vmax.f32 %v1399_v38, 1.0  ;;  %vm1413_vm0 = vcmp.gt.f32.partialorder %v1399_v38, 0.0 }
0x1191   : > { %v1401_v40 = vpop.f32.mrf.mxu1  ;;  %v1414_v44 = vsel %vm1413_vm0, 1, %v2071_v14 }
0x1192   : > { %2001 = vrcp.f32 %v1405_v39 }
0x1193   : > { %v1402_v41 = vpop.f32.mrf.mxu1 }
0x1194   : > { %v2073_v41 = vmov 1966171168  }
0x1195   : > { %v1403_v42 = vpop.f32.mrf.mxu1 }
0x1196   : > { %v1722_v42 = vunpack.c.l.s4 %v2073_v41 }
0x119f   : > { %v2002_v43 = vpop.eup %2001 }
0x11a0   : > { %1409 = vperm.xlu0 %1983, %v2002_v43  }
0x11a4   : > { %1416 = vperm.xlu0 %1983, %v1414_v44  }
0x121b   : > { %v1410_v45 = vpop.permute.xlu0 %1409 }
0x121c   : > { %v1412_v46 = vmul.f32 %v1410_v45, %v1399_v38 }
0x121f   : > { %v1417_v47 = vpop.permute.xlu0 %1416 }
0x1220   : > { %vm1418_vm1 = vcmp.eq.s32.totalorder %v1417_v47, 1 }
0x1221   : > { %v1419_v48 = vsel %vm1418_vm1, %v1412_v46, %v1270_v4 }
0x1222   : > { %v1420_v49 = vpack.c.bf16 %v1419_v48, %v1419_v48 }
0x1224   : > { %1918 = vmatmul.mubr.msk.bf16.vlgmr.msra.gmra.mxu0 %vm217_vm6, %v1420_v49  ;;  %v1465_v9 = vunpack.c.l.bf16 %v1420_v49  ;;  %v1723_v49 = vunpack.c.0.s8 %v1722_v42 }
0x1225   : > { %1588 = vmatpush1.bf16.msra.mxu0 %v2165_v13  ;;  %1605 = vmatprep.mubr.bf16.mxu0 %v2071_v14 }
0x1226   : > { %v1466_v50 = vmul.f32 %v1465_v9, %v1465_v9 }
0x1228   : > { %v1467_v51 = vsel %vm274_vm7, %v1466_v50, 0.0 }
0x1229   : > { %1468 = vadd.xlane.f32.xlu0 %v1467_v51 }
0x12b2   : > { %v1469_v54 = vpop.xlane.xlu0 %1468 }
0x12e4   : > { %v1458_v52 = vpop.f32.mrf.mxu0 }
0x12e5   : > { %v1470_v53 = vmul.f32 2.0, %v1458_v52 }
0x12e6   : > { %v1460_v55 = vpop.f32.mrf.mxu0 }
0x12e7   : > { %v1472_v56 = vsub.f32 %v1469_v54, %v1470_v53  ;;  %v1471_v57 = vmul.f32 2.0, %v1460_v55 }
0x12e8   : > { %v1462_v58 = vpop.f32.mrf.mxu0 }
0x12e9   : > { %v1476_v59 = vrot.slane %v1472_v56, 7  ;;  %v1473_v60 = vsub.f32 %v1469_v54, %v1471_v57  ;;  %v1726_v54 = vsub.s32 %v1723_v49, %v2143_v1 }
0x12ea   : > { %v1463_v61 = vpop.f32.mrf.mxu0 }
0x12eb   : > { %vm1480_vm2 = vcmp.lt.f32.partialorder %v1472_v56, %v1476_v59  ;;  %v1477_v62 = vrot.slane %v1473_v60, 7 }
0x12ec   : > { %v1484_v63 = vsel %vm1480_vm2, %v1472_v56, %v1476_v59  ;;  %v1482_v13 = vsel %vm1480_vm2, 1, %v2071_v14 }
0x12ed   : > { %v1488_v2 = vrot.slane %v1484_v63, 7  ;;  %vm1481_vm3 = vcmp.lt.f32.partialorder %v1473_v60, %v1477_v62  ;;  %v1494_v3 = vrot.slane %v1482_v13, 7 }
0x12ee   : > { %v1483_v4 = vsel %vm1481_vm3, 1, %v2071_v14  ;;  %v1485_v5 = vsel %vm1481_vm3, %v1473_v60, %v1477_v62 }
0x12ef   : > { %v1489_v6 = vrot.slane %v1485_v5, 7  ;;  %v1495_v7 = vrot.slane %v1483_v4, 7  ;;  %vm1492_vm4 = vcmp.lt.f32.partialorder %v1472_v56, %v1488_v2 }
0x12f0   : > { %v1496_v8 = vsel %vm1492_vm4, 2, %v1494_v3  ;;  %vm1738_vm4 = vcmp.lt.s32.totalorder %v154_v0, 256 }
0x12f1   : > { %vm1493_vm5 = vcmp.lt.f32.partialorder %v1473_v60, %v1489_v6  ;;  %v1501_v15 = vrot.slane %v1496_v8, %v2183_v37 }
0x12f2   : > { %v1497_v16 = vsel %vm1493_vm5, 2, %v1495_v7 }
0x12f3   : > { %v1505_v17 = vrot.slane %v1497_v16, %v2183_v37  ;;  %vm1506_vm8 = vcmp.eq.s32.totalorder %v1501_v15, %v2143_v1 }
0x12f4   : > { %vm1923_vm11 = vmpackc.low %vm1506_vm8, %vm1506_vm8 }
0x12f5   : > { %vm1507_vm9 = vcmp.eq.s32.totalorder %v1505_v17, %v2143_v1 }
0x12f6   : > { %vm1921_vm10 = vmpackc.low %vm1507_vm9, %vm1507_vm9 }
0x12f7   : > { %1922 = vmatprep.mubr.msk.bf16.mxu1 %vm1921_vm10, %v2070_v11 }
0x12f8   : > { %1924 = vmatmul.mubr.msk.bf16.vlgmr.msra.gmra.mxu1 %vm1923_vm11, %v2070_v11 }
0x12f9   : > { %1678 = vmatpush1.bf16.xpose.msra.mxu1 %v2153_v10 }
0x13b8   : > { %v1548_v18 = vpop.f32.mrf.mxu1 }
0x13b9   : > { %v1554_v19 = vmax.f32 %v1548_v18, 1.0  ;;  %vm1562_vm12 = vcmp.gt.f32.partialorder %v1548_v18, 0.0 }
0x13ba   : > { %v1550_v20 = vpop.f32.mrf.mxu1  ;;  %v1563_v24 = vsel %vm1562_vm12, 1, %v2071_v14 }
0x13bb   : > { %2003 = vrcp.f32 %v1554_v19 }
0x13bc   : > { %v1551_v21 = vpop.f32.mrf.mxu1 }
0x13be   : > { %v1552_v22 = vpop.f32.mrf.mxu1 }
0x13c8   : > { %v2004_v23 = vpop.eup %2003 }
0x13c9   : > { %1558 = vperm.xlu1 %1984, %v2004_v23  }
0x13cd   : > { %1565 = vperm.xlu1 %1984, %v1563_v24  }
0x1444   : > { %v1559_v25 = vpop.permute.xlu1 %1558 }
0x1445   : > { %v1561_v26 = vmul.f32 %v1559_v25, %v1548_v18 }
0x1448   : > { %v1566_v27 = vpop.permute.xlu1 %1565 }
0x1449   : > { %vm1567_vm13 = vcmp.eq.s32.totalorder %v1566_v27, 1 }
0x144a   : > { %v1568_v28 = vsel %vm1567_vm13, %v1561_v26, %v1419_v48 }
0x144b   : > { %v1569_v12 = vpack.c.bf16 %v1568_v28, %v1568_v28 }
0x144d   : > { %1925 = vmatmul.mubr.msk.bf16.vlgmr.msra.gmra.mxu0 %vm217_vm6, %v1569_v12  ;;  %v1614_v10 = vunpack.c.l.bf16 %v1569_v12 }
0x144f   : > { %v1615_v29 = vmul.f32 %v1614_v10, %v1614_v10 }
0x1451   : > { %v1616_v30 = vsel %vm274_vm7, %v1615_v29, 0.0 }
0x1452   : > { %1617 = vadd.xlane.f32.xlu1 %v1616_v30 }
0x14db   : > { %v1618_v33 = vpop.xlane.xlu1 %1617 }
0x150d   : > { %v1607_v31 = vpop.f32.mrf.mxu0 }
0x150e   : > { %v1619_v32 = vmul.f32 2.0, %v1607_v31 }
0x150f   : > { %v1609_v34 = vpop.f32.mrf.mxu0 }
0x1510   : > { %v1621_v35 = vsub.f32 %v1618_v33, %v1619_v32  ;;  %v1620_v36 = vmul.f32 2.0, %v1609_v34 }
0x1511   : > { %v1611_v38 = vpop.f32.mrf.mxu0 }
0x1512   : > { %v1625_v39 = vrot.slane %v1621_v35, 7  ;;  %v1622_v40 = vsub.f32 %v1618_v33, %v1620_v36 }
0x1513   : > { %v1612_v43 = vpop.f32.mrf.mxu0 }
0x1514   : > { %vm1629_vm14 = vcmp.lt.f32.partialorder %v1621_v35, %v1625_v39  ;;  %v1626_v44 = vrot.slane %v1622_v40, 7 }
0x1515   : > { %v1633_v45 = vsel %vm1629_vm14, %v1621_v35, %v1625_v39  ;;  %v1631_v46 = vsel %vm1629_vm14, 1, %v2071_v14 }
0x1516   : > { %v1637_v47 = vrot.slane %v1633_v45, 7  ;;  %vm1630_vm6 = vcmp.lt.f32.partialorder %v1622_v40, %v1626_v44  ;;  %v1643_v48 = vrot.slane %v1631_v46, 7 }
0x1517   : > { %v1632_v9 = vsel %vm1630_vm6, 1, %v2071_v14  ;;  %v1634_v50 = vsel %vm1630_vm6, %v1622_v40, %v1626_v44 }
0x1518   : > { %v1638_v51 = vrot.slane %v1634_v50, 7  ;;  %vm1641_vm7 = vcmp.lt.f32.partialorder %v1621_v35, %v1637_v47  ;;  %v1644_v52 = vrot.slane %v1632_v9, 7 }
0x1519   : > { %v1645_v53 = vsel %vm1641_vm7, 2, %v1643_v48 }
0x151a   : > { %vm1642_vm15 = vcmp.lt.f32.partialorder %v1622_v40, %v1638_v51  ;;  %v1650_v55 = vrot.slane %v1645_v53, %v2183_v37 }
0x151b   : > { %v1646_v56 = vsel %vm1642_vm15, 2, %v1644_v52 }
0x151c   : > { %v1654_v57 = vrot.slane %v1646_v56, %v2183_v37  ;;  %v1720_v58 = vcombine.low %v1645_v53, %v1646_v56  ;;  %vm1655_vm0 = vcmp.eq.s32.totalorder %v1650_v55, %v2143_v1 }
0x151d   : > { %vm1930_vm3 = vmpackc.low %vm1655_vm0, %vm1655_vm0 }
0x151e   : > { %vm1656_vm1 = vcmp.eq.s32.totalorder %v1654_v57, %v2143_v1  ;;  %v1727_v59 = vrot.slane %v1720_v58, %v1726_v54 }
0x151f   : > { %vm1928_vm2 = vmpackc.low %vm1656_vm1, %vm1656_vm1 }
0x1520   : > { %1929 = vmatprep.mubr.msk.bf16.mxu1 %vm1928_vm2, %v2070_v11  ;;  %v1734_v60 = vrot.slane %v1727_v59, %v1726_v54 }
0x1521   : > { %1931 = vmatmul.mubr.msk.bf16.vlgmr.msra.gmra.mxu1 %vm1930_vm3, %v2070_v11 }
0x1522   : > { %v1735_v61 = vcombine.high %v1734_v60, %v1734_v60 }
0x1524   : > { %1740 = vst.msk [vmem:[%s143_s28] sm:$0x3] %vm1738_vm4, %v1735_v61 }
0x15e1   : > { %v1697_v37 = vpop.f32.mrf.mxu1 }
0x15e2   : > { %v1703_v62 = vmax.f32 %v1697_v37, 1.0  ;;  %vm1711_vm5 = vcmp.gt.f32.partialorder %v1697_v37, 0.0 }
0x15e3   : > { %v1699_v63 = vpop.f32.mrf.mxu1  ;;  %v1712_v0 = vsel %vm1711_vm5, 1, %v2071_v14 }
0x15e4   : > { %2005 = vrcp.f32 %v1703_v62 }
0x15e5   : > { %v1700_v1 = vpop.f32.mrf.mxu1 }
0x15e7   : > { %v1701_v13 = vpop.f32.mrf.mxu1 }
0x15f1   : > { %v2006_v2 = vpop.eup %2005 }
0x15f2   : > { %1707 = vperm.xlu0 %1983, %v2006_v2  }
0x15f3   : > { %2020 = shalt.err (!%p2017_p3)
}
0x15f4   : > { %s2021_s13 = scalar_lea.hbm %s1761_s5, 32  ;;  %s2025_s23 = scalar_lea.hbm %s2375_s2, 64 }
0x15f5   : > { %p2022_p4 = scmp.ne.s32.totalorder %s1761_s5, %s2021_s13  ;;  %p2026_p9 = scmp.lt.s32.totalorder %s1761_s5, %s2375_s2 }
0x15f6   : > { %p2027_p10 = scmp.lt.s32.totalorder %s2025_s23, %s2021_s13 }
0x15f7   : > { %p2023_p7 = pnand %p2022_p4, %p2128_p5 }
0x15f8   : > { %p2028_p11 = por %p2027_p10, %p2026_p9 }
0x15f9   : > { %p2024_p8 = pneg %p2023_p7 }
0x15fb   : > { %p2029_p12 = pnand %p2028_p11, %p2024_p8 }
0x15fd   : > { %2032 = shalt.err (!%p2029_p12)
}
0x15fe   : > { %1939 = dma.vmem_to_hbm [thread:$0]  (%p2128_p5), %s1764_s30, 32, %s1761_s5, %s1746_s6   ;;  %1714 = vperm.xlu0 %1983, %v1712_v0   ;;  %vm1718_vm8 = vcmask 26624  }
0x15ff   : > { %s1853_s26 = sshll.u32 %s2140_s21, 2 }
0x1600   : > { %s152_s29 = scalar_lea.vmem %s2374_s1, %s1853_s26 }
0x166d   : > { %v1708_v11 = vpop.permute.xlu0 %1707 }
0x166e   : > { %v1710_v14 = vmul.f32 %v1708_v11, %v1697_v37 }
0x1679   : > { %v1715_v3 = vpop.permute.xlu0 %1714 }
0x167a   : > { %vm1716_vm9 = vcmp.eq.s32.totalorder %v1715_v3, 1 }
0x167b   : > { %v1717_v4 = vsel %vm1716_vm9, %v1710_v14, 0.0 }
0x167c   : > { %1719 = vst.msk [vmem:[%s152_s29] sm:$0x7] %vm1718_vm8, %v1717_v4 }
0x167d PF: > { %p1945_p13 = scmp.ge.s32.totalorder %s2067_s12, 2  ;;  %s1782_s19 = sand.u32 1, %s2055_s9  }
0x167e   : > { %s1783_s21 = scalar_lea.sflag [#allocation3], %s1782_s19 }
0x167f   : > { %p1942_p5 = pnand %p1945_p13, %p2132_p6 }
0x1681   : > { %p1943_p0 = pneg %p1942_p5 }
0x1683   : > { %2050 = dma.done.wait (%p1943_p0), %s1783_s21, 32  }
0x1684   : > { %2052 = vsyncadd (%p1943_p0), %s1783_s21, 4294967264  ;;  %p13_p1 = scmp.ge.s32.totalorder %s2115_s15, 4   ;;  %s2378_s9 = smov %s2059_s10 }
0x1685   : > { %s2379_s10 = smov %s2063_s11  ;;  %s2380_s11 = smov %s2126_s18 }
0x1686   : > { %s2381_s12 = smov %s2115_s15  ;;  %15 = sbr.rel (!%p13_p1) target bundleno = 3 (0x3), region = 71 }
0x168b   :  { %1788 = vsyncpa [#allocation3], 1 }
0x168c   :  { %1790 = vsyncpa [#allocation3 + $0x1], 1 }

</bundles_post_ra>
